<compile_context>
chip_gen: v5e
topology: v5e:2x2
jax: 0.10.0
libtpu: 0.0.40
codegen_flags: <defaults>
</compile_context>

<pallas_src>
import jax
import jax.numpy as jnp
from jax.experimental import pallas as pl
from jax.experimental.pallas import tpu as pltpu

# ----------------------------- model dimensions ------------------------------
B = 2                # batch
L = 8                # sequence length (residues)
N_TORS = 6           # BB_tors channels (3 torsions x sin/cos)
C_GEOM = 16          # geom_maps channels (NCHW)
SEQ_CH = 32          # config.structure_module.seq_channel
PAIR_CH = 32         # config.structure_module.pair_channel
NOISE_CH = 32        # config.structure_module.noise_channel
SINGLE_TGT = 6       # config.diffevoformer.single_target_dim
PAIR_TGT = 16        # config.diffevoformer.pair_target_dim
AFFINE_DIM = 7       # quaternion (4) + translation (3)
RELPOS_K = 4
N_EVO_BLOCKS = 2
N_SM_LAYERS = 2
PAIR_UPDATED = True  # config.structure_module.pair_updated

RELPOS_DIM = 2 * RELPOS_K + 1


# --------------------------- deterministic params ----------------------------
def _init_linear(key, in_dim, out_dim):
    kw, kb = jax.random.split(key)
    w = jax.random.normal(kw, (in_dim, out_dim), jnp.float32) / jnp.sqrt(in_dim)
    b = 0.01 * jax.random.normal(kb, (1, out_dim), jnp.float32)  # (1,N): broadcast-ready
    return {"w": w, "b": b}


def build_params(key):
    ks = iter(jax.random.split(key, 64))
    p = {}
    # ContinousNoiseSchedual (sinusoidal -> MLP)
    p["noise_mlp1"] = _init_linear(next(ks), NOISE_CH, NOISE_CH)
    p["noise_mlp2"] = _init_linear(next(ks), NOISE_CH, NOISE_CH)
    # DiffEvoformer input embedders
    p["single_embed"] = _init_linear(next(ks), N_TORS, SEQ_CH)
    p["noise_to_single"] = _init_linear(next(ks), NOISE_CH, SEQ_CH)
    p["pair_embed"] = _init_linear(next(ks), C_GEOM, PAIR_CH)
    p["relpos_embed"] = _init_linear(next(ks), RELPOS_DIM, PAIR_CH)
    # DiffEvoformer blocks (transition approximations)
    p["evo"] = []
    for _ in range(N_EVO_BLOCKS):
        p["evo"].append({
            "single_t1": _init_linear(next(ks), SEQ_CH, 2 * SEQ_CH),
            "single_t2": _init_linear(next(ks), 2 * SEQ_CH, SEQ_CH),
            "pair_t1": _init_linear(next(ks), PAIR_CH, 2 * PAIR_CH),
            "pair_t2": _init_linear(next(ks), 2 * PAIR_CH, PAIR_CH),
        })
    # AffineGenerator_nSC (structure module approximation)
    p["noise_to_act"] = _init_linear(next(ks), NOISE_CH, SEQ_CH)
    p["sm"] = []
    for _ in range(N_SM_LAYERS):
        p["sm"].append({
            "act1": _init_linear(next(ks), SEQ_CH, SEQ_CH),
            "act2": _init_linear(next(ks), SEQ_CH, SEQ_CH),
            "affine_update": _init_linear(next(ks), SEQ_CH, AFFINE_DIM),
            "pair1": _init_linear(next(ks), PAIR_CH, PAIR_CH),
            "pair2": _init_linear(next(ks), PAIR_CH, PAIR_CH),
        })
    # output heads (only used when pair_updated)
    p["single_out"] = _init_linear(next(ks), SEQ_CH, SINGLE_TGT)
    p["pair_out"] = _init_linear(next(ks), PAIR_CH, PAIR_TGT)
    return p


# --------------------------- static parameter packing -------------------------
def _round_up(x, m):
    return (x + m - 1) // m * m


def _layer_specs():
    """Static (name, in_dim, out_dim) list — defines the blob layout."""
    specs = [
        ("noise_mlp1", NOISE_CH, NOISE_CH),
        ("noise_mlp2", NOISE_CH, NOISE_CH),
        ("single_embed", N_TORS, SEQ_CH),
        # noise_to_single ‖ noise_to_act fused along N (shared LHS cnoise_emb)
        ("noise_fused", NOISE_CH, 2 * SEQ_CH),
        # pair_embed stacked over relpos_embed along K (shared output row space)
        ("pair_rel_embed", C_GEOM + RELPOS_DIM, PAIR_CH),
    ]
    for i in range(N_EVO_BLOCKS):
        specs += [
            (f"evo{i}_single_t1", SEQ_CH, 2 * SEQ_CH),
            (f"evo{i}_single_t2", 2 * SEQ_CH, SEQ_CH),
            (f"evo{i}_pair_t1", PAIR_CH, 2 * PAIR_CH),
            (f"evo{i}_pair_t2", 2 * PAIR_CH, PAIR_CH),
        ]
    for i in range(N_SM_LAYERS):
        specs += [
            (f"sm{i}_act1", SEQ_CH, SEQ_CH),
            (f"sm{i}_act2", SEQ_CH, SEQ_CH),
            (f"sm{i}_pair1", PAIR_CH, PAIR_CH),
            (f"sm{i}_pair2", PAIR_CH, PAIR_CH),
        ]
        if i == N_SM_LAYERS - 1:
            # last-layer affine_update ‖ single_out fused along N (shared final act)
            specs.append((f"sm{i}_affine_single", SEQ_CH, AFFINE_DIM + SINGLE_TGT))
        else:
            specs.append((f"sm{i}_affine", SEQ_CH, AFFINE_DIM))
    specs.append(("pair_out", PAIR_CH, PAIR_TGT))
    return specs


LAYER_SPECS = _layer_specs()
BLOB_W = max(d_out for _, _, d_out in LAYER_SPECS)          # = 64


def _compute_offsets():
    offsets, off = {}, 0
    for name, d_in, d_out in LAYER_SPECS:
        offsets[name] = (off, d_in, d_out)
        off += _round_up(d_in + 1, 8)     # weight rows + 1 bias row, 8-row aligned
    return offsets, off


OFFSETS, BLOB_ROWS = _compute_offsets()


def _fused_weight_table(params):
    """Map packed-layer name -> (w, b), applying the trace-time N/K fusions."""
    d = {
        "noise_mlp1": (params["noise_mlp1"]["w"], params["noise_mlp1"]["b"]),
        "noise_mlp2": (params["noise_mlp2"]["w"], params["noise_mlp2"]["b"]),
        "single_embed": (params["single_embed"]["w"], params["single_embed"]["b"]),
        "noise_fused": (
            jnp.concatenate([params["noise_to_single"]["w"], params["noise_to_act"]["w"]], axis=1),
            jnp.concatenate([params["noise_to_single"]["b"], params["noise_to_act"]["b"]], axis=1),
        ),
        "pair_rel_embed": (
            jnp.concatenate([params["pair_embed"]["w"], params["relpos_embed"]["w"]], axis=0),
            params["pair_embed"]["b"] + params["relpos_embed"]["b"],
        ),
        "pair_out": (params["pair_out"]["w"], params["pair_out"]["b"]),
    }
    for i, blk in enumerate(params["evo"]):
        for nm in ("single_t1", "single_t2", "pair_t1", "pair_t2"):
            d[f"evo{i}_{nm}"] = (blk[nm]["w"], blk[nm]["b"])
    for i, lyr in enumerate(params["sm"]):
        for nm in ("act1", "act2", "pair1", "pair2"):
            d[f"sm{i}_{nm}"] = (lyr[nm]["w"], lyr[nm]["b"])
        if i == N_SM_LAYERS - 1:
            d[f"sm{i}_affine_single"] = (
                jnp.concatenate([lyr["affine_update"]["w"], params["single_out"]["w"]], axis=1),
                jnp.concatenate([lyr["affine_update"]["b"], params["single_out"]["b"]], axis=1),
            )
        else:
            d[f"sm{i}_affine"] = (lyr["affine_update"]["w"], lyr["affine_update"]["b"])
    return d


def pack_params(params):
    """Pack every linear layer into one [BLOB_ROWS, BLOB_W] f32 blob (single DMA)."""
    wtab = _fused_weight_table(params)
    blocks = []
    for name, d_in, d_out in LAYER_SPECS:
        w, b = wtab[name]
        blk_h = _round_up(d_in + 1, 8)
        wb = jnp.concatenate([w, b.reshape(1, d_out)], axis=0)       # [d_in+1, d_out]
        wb = jnp.pad(wb, ((0, blk_h - (d_in + 1)), (0, BLOB_W - d_out)))
        blocks.append(wb)
    return jnp.concatenate(blocks, axis=0)                           # [BLOB_ROWS, BLOB_W]


# ------------------------------ fused Pallas kernel ---------------------------
def _fused_forward_kernel(row_ref, pair_ref, blob_ref, out_row_ref, out_pair_ref):
    def lin(x, name, act=None):
        off, d_in, d_out = OFFSETS[name]                 # static Python ints -> free views
        w = blob_ref[off:off + d_in, 0:d_out]
        b = blob_ref[off + d_in:off + d_in + 1, 0:d_out]
        y = jnp.dot(x, w, preferred_element_type=jnp.float32) + b
        if act == "relu":
            y = jax.nn.relu(y)
        elif act == "silu":
            y = jax.nn.silu(y)
        return y

    # --- packed per-residue inputs (noise emb pre-repeated at trace time) ---
    row = row_ref[...]                                              # [B*L, 45]
    emb = row[:, :NOISE_CH]                                         # [B*L, 32]
    tors = row[:, NOISE_CH:NOISE_CH + N_TORS]                       # [B*L, 6]
    affine = row[:, NOISE_CH + N_TORS:NOISE_CH + N_TORS + AFFINE_DIM]  # [B*L, 7]

    # --- ContinousNoiseSchedual MLP + fused noise projections ---
    cnoise_emb = lin(lin(emb, "noise_mlp1", "silu"), "noise_mlp2")  # [B*L, 32]
    nz = lin(cnoise_emb, "noise_fused")                             # [B*L, 64]
    noise_single = nz[:, :SEQ_CH]
    noise_act = nz[:, SEQ_CH:]

    # --- DiffEvoformer input embedders (relpos one-hot fused into pair embed) ---
    single = lin(tors, "single_embed") + noise_single               # [B*L, 32]
    pair = lin(pair_ref[...], "pair_rel_embed")                     # [B*L*L, 32]

    # --- DiffEvoformer blocks (transition approximation) ---
    for i in range(N_EVO_BLOCKS):
        single = single + lin(lin(single, f"evo{i}_single_t1", "relu"), f"evo{i}_single_t2")
        pair = pair + lin(lin(pair, f"evo{i}_pair_t1", "relu"), f"evo{i}_pair_t2")

    # --- AffineGenerator_nSC (structure-module approximation) ---
    act = single
    single_o = None
    for i in range(N_SM_LAYERS):
        h = lin(act + noise_act, f"sm{i}_act1", "relu")
        act = act + lin(h, f"sm{i}_act2")
        if PAIR_UPDATED:
            pair = pair + lin(lin(pair, f"sm{i}_pair1", "relu"), f"sm{i}_pair2")
        # TODO(synk): true quaternion composition of affine updates not specified; additive update used.
        if i == N_SM_LAYERS - 1:
            upd = lin(act, f"sm{i}_affine_single")                  # [B*L, 7+6]
            affine = affine + upd[:, :AFFINE_DIM]
            single_o = upd[:, AFFINE_DIM:]
        else:
            affine = affine + lin(act, f"sm{i}_affine")

    # --- packed outputs: one row slab (affine ‖ single) + one pair slab ---
    out_row_ref[...] = jnp.concatenate([affine, single_o], axis=1).astype(out_row_ref.dtype)
    out_pair_ref[...] = lin(pair, "pair_out").astype(out_pair_ref.dtype)


def _vmem_spec():
    return pl.BlockSpec(memory_space=pltpu.MemorySpace.VMEM)


# ------------------------------- forward pass --------------------------------
def reconstruct_affine_forward(blob, geom_maps, BB_tors, quataffine, cnoise):
    # prepare_repr: residue_index = arange(L); it only feeds the rel-pos one-hot,
    # which (like the NCHW permute and the sinusoidal embedding) is tiny and done
    # once at trace time, outside the fused kernel.
    half = NOISE_CH // 2
    freqs = jnp.exp(-jnp.log(10000.0) * jnp.arange(half, dtype=jnp.float32) / half)
    ang = cnoise[:, None] * freqs[None, :]
    emb = jnp.concatenate([jnp.sin(ang), jnp.cos(ang)], axis=-1)      # [B, NOISE_CH]
    emb_rows = jnp.repeat(emb, L, axis=0)                             # [B*L, NOISE_CH]

    tors2 = BB_tors.reshape(B * L, N_TORS)
    aff2 = quataffine.reshape(B * L, AFFINE_DIM)
    row_slab = jnp.concatenate([emb_rows, tors2, aff2], axis=1)       # [B*L, 45]

    pair_in = jnp.transpose(geom_maps, (0, 2, 3, 1)).reshape(B * L * L, C_GEOM)  # NCHW -> NHWC rows
    ri = jnp.arange(L, dtype=jnp.int32)
    offs = jnp.clip(ri[:, None] - ri[None, :], -RELPOS_K, RELPOS_K) + RELPOS_K
    rel = jax.nn.one_hot(offs, RELPOS_DIM, dtype=jnp.float32).reshape(L * L, RELPOS_DIM)
    rel = jnp.tile(rel, (B, 1))                                       # [B*L*L, 9]
    pair_slab = jnp.concatenate([pair_in, rel], axis=1)               # [B*L*L, 25]

    # One grid-less pallas_call: 3 input DMAs (row slab, pair slab, param blob),
    # 2 output DMAs; all weights + activations stay VMEM/vreg resident (~0.4 MB).
    out_row, out_pair = pl.pallas_call(
        _fused_forward_kernel,
        out_shape=(
            jax.ShapeDtypeStruct((B * L, AFFINE_DIM + SINGLE_TGT), jnp.float32),
            jax.ShapeDtypeStruct((B * L * L, PAIR_TGT), jnp.float32),
        ),
        in_specs=[_vmem_spec(), _vmem_spec(), _vmem_spec()],
        out_specs=(_vmem_spec(), _vmem_spec()),
    )(row_slab, pair_slab, blob)

    affine_last = out_row[:, :AFFINE_DIM].reshape(B, L, AFFINE_DIM)
    if not PAIR_UPDATED:
        return affine_last
    single_out = out_row[:, AFFINE_DIM:].reshape(B, L, SINGLE_TGT)
    pair_out = jnp.transpose(out_pair.reshape(B, L, L, PAIR_TGT), (0, 3, 1, 2))  # -> NCHW
    return affine_last, single_out, pair_out


# --------------------------- pure-JAX reference -------------------------------
def reference_forward(params, geom_maps, BB_tors, quataffine, cnoise):
    hp = jax.lax.Precision.HIGHEST

    def lin(x, layer, act=None):
        y = jnp.dot(x, layer["w"], precision=hp) + layer["b"]
        if act == "relu":
            y = jax.nn.relu(y)
        elif act == "silu":
            y = jax.nn.silu(y)
        return y

    half = NOISE_CH // 2
    freqs = jnp.exp(-jnp.log(10000.0) * jnp.arange(half, dtype=jnp.float32) / half)
    ang = cnoise[:, None] * freqs[None, :]
    emb = jnp.concatenate([jnp.sin(ang), jnp.cos(ang)], axis=-1)
    cne = lin(lin(emb, params["noise_mlp1"], "silu"), params["noise_mlp2"])

    single = lin(BB_tors, params["single_embed"]) + lin(cne, params["noise_to_single"])[:, None, :]
    pair = lin(jnp.transpose(geom_maps, (0, 2, 3, 1)), params["pair_embed"])
    ri = jnp.arange(L)
    offs = jnp.clip(ri[:, None] - ri[None, :], -RELPOS_K, RELPOS_K) + RELPOS_K
    oneh = jax.nn.one_hot(offs, RELPOS_DIM, dtype=jnp.float32)
    pair = pair + lin(oneh, params["relpos_embed"])[None]

    for blk in params["evo"]:
        single = single + lin(lin(single, blk["single_t1"], "relu"), blk["single_t2"])
        pair = pair + lin(lin(pair, blk["pair_t1"], "relu"), blk["pair_t2"])

    nb = lin(cne, params["noise_to_act"])[:, None, :]
    act, affine = single, quataffine
    for lyr in params["sm"]:
        h = lin(act + nb, lyr["act1"], "relu")
        act = act + lin(h, lyr["act2"])
        pair = pair + lin(lin(pair, lyr["pair1"], "relu"), lyr["pair2"])
        affine = affine + lin(act, lyr["affine_update"])

    single_out = lin(act, params["single_out"])
    pair_out = jnp.transpose(lin(pair, params["pair_out"]), (0, 3, 1, 2))
    return affine, single_out, pair_out


# ----------------------------------- main -------------------------------------
if __name__ == "__main__":
    key = jax.random.PRNGKey(0)
    k_p, k_g, k_t, k_a, k_n = jax.random.split(key, 5)

    params = build_params(k_p)
    blob = jax.block_until_ready(pack_params(params))                 # pack once, reuse every call

    geom_maps = jax.random.normal(k_g, (B, C_GEOM, L, L), jnp.float32)   # NCHW
    BB_tors = jax.random.normal(k_t, (B, L, N_TORS), jnp.float32)
    quataffine = jax.random.normal(k_a, (B, L, AFFINE_DIM), jnp.float32)
    cnoise = jax.random.uniform(k_n, (B,), jnp.float32)

    fwd = jax.jit(reconstruct_affine_forward)
    out = fwd(blob, geom_maps, BB_tors, quataffine, cnoise)
    out = jax.block_until_ready(out)
    affine_last, single_out, pair_out = out

    assert affine_last.shape == (B, L, AFFINE_DIM)
    assert single_out.shape == (B, L, SINGLE_TGT)
    assert pair_out.shape == (B, PAIR_TGT, L, L)

    # numerical check against the pure-JAX reference (relative Frobenius error)
    ref = reference_forward(params, geom_maps, BB_tors, quataffine, cnoise)
    for got, want in zip(out, ref):
        num = jnp.sqrt(jnp.sum((got - want) ** 2))
        den = jnp.sqrt(jnp.sum(want ** 2)) + 1e-6
        rel = float(num / den)
        assert rel < 3e-2, f"relative error too large: {rel}"

    print("KERNEL_OK")
</pallas_src>

<mosaic_0001>
module attributes {stable_mosaic.version = 11 : i64} {
  func.func @_fused_forward_kernel(%arg0: memref<16x45xf32, #tpu.memory_space<vmem>>, %arg1: memref<128x25xf32, #tpu.memory_space<vmem>>, %arg2: memref<1048x64xf32, #tpu.memory_space<vmem>>, %arg3: memref<16x13xf32, #tpu.memory_space<vmem>>, %arg4: memref<128x16xf32, #tpu.memory_space<vmem>>) attributes {dimension_semantics = [], scalar_prefetch = 0 : i64, scratch_operands = 0 : i64, tpu.core_type = #tpu.core_type<tc>} {
    %c0 = arith.constant 0 : index
    %c0_0 = arith.constant 0 : index
    %0 = vector.load %arg0[%c0, %c0_0] : memref<16x45xf32, #tpu.memory_space<vmem>>, vector<16x45xf32>
    %1 = vector.extract_strided_slice %0 {offsets = [0, 0], sizes = [16, 32], strides = [1, 1]} : vector<16x45xf32> to vector<16x32xf32>
    %2 = vector.extract_strided_slice %0 {offsets = [0, 32], sizes = [16, 6], strides = [1, 1]} : vector<16x45xf32> to vector<16x6xf32>
    %3 = vector.extract_strided_slice %0 {offsets = [0, 38], sizes = [16, 7], strides = [1, 1]} : vector<16x45xf32> to vector<16x7xf32>
    %c0_1 = arith.constant 0 : index
    %c0_2 = arith.constant 0 : index
    %4 = vector.load %arg2[%c0_1, %c0_2] : memref<1048x64xf32, #tpu.memory_space<vmem>>, vector<32x32xf32>
    %c32 = arith.constant 32 : index
    %c0_3 = arith.constant 0 : index
    %5 = vector.load %arg2[%c32, %c0_3] : memref<1048x64xf32, #tpu.memory_space<vmem>>, vector<1x32xf32>
    %cst = arith.constant dense<0.000000e+00> : vector<16x32xf32>
    %6 = tpu.matmul %1, %4, %cst {dimension_numbers = #tpu.dot_dimension_numbers<[1], [0], [0], [1], [0, 0, 1, 1], [], []>} : vector<16x32xf32>, vector<32x32xf32>, vector<16x32xf32> -> vector<16x32xf32>
    %7 = vector.broadcast %5 : vector<1x32xf32> to vector<16x32xf32>
    %8 = arith.addf %6, %7 : vector<16x32xf32>
    %9 = arith.negf %8 : vector<16x32xf32>
    %10 = math.exp %9 : vector<16x32xf32>
    %cst_4 = arith.constant 1.000000e+00 : f32
    %11 = vector.broadcast %cst_4 : f32 to vector<16x32xf32>
    %12 = arith.addf %11, %10 : vector<16x32xf32>
    %13 = arith.divf %11, %12 : vector<16x32xf32>
    %14 = arith.mulf %8, %13 : vector<16x32xf32>
    %c40 = arith.constant 40 : index
    %c0_5 = arith.constant 0 : index
    %15 = vector.load %arg2[%c40, %c0_5] : memref<1048x64xf32, #tpu.memory_space<vmem>>, vector<32x32xf32>
    %c72 = arith.constant 72 : index
    %c0_6 = arith.constant 0 : index
    %16 = vector.load %arg2[%c72, %c0_6] : memref<1048x64xf32, #tpu.memory_space<vmem>>, vector<1x32xf32>
    %cst_7 = arith.constant dense<0.000000e+00> : vector<16x32xf32>
    %17 = tpu.matmul %14, %15, %cst_7 {dimension_numbers = #tpu.dot_dimension_numbers<[1], [0], [0], [1], [0, 0, 1, 1], [], []>} : vector<16x32xf32>, vector<32x32xf32>, vector<16x32xf32> -> vector<16x32xf32>
    %18 = vector.broadcast %16 : vector<1x32xf32> to vector<16x32xf32>
    %19 = arith.addf %17, %18 : vector<16x32xf32>
    %c88 = arith.constant 88 : index
    %c0_8 = arith.constant 0 : index
    %20 = vector.load %arg2[%c88, %c0_8] : memref<1048x64xf32, #tpu.memory_space<vmem>>, vector<32x64xf32>
    %c120 = arith.constant 120 : index
    %c0_9 = arith.constant 0 : index
    %21 = vector.load %arg2[%c120, %c0_9] : memref<1048x64xf32, #tpu.memory_space<vmem>>, vector<1x64xf32>
    %cst_10 = arith.constant dense<0.000000e+00> : vector<16x64xf32>
    %22 = tpu.matmul %19, %20, %cst_10 {dimension_numbers = #tpu.dot_dimension_numbers<[1], [0], [0], [1], [0, 0, 1, 1], [], []>} : vector<16x32xf32>, vector<32x64xf32>, vector<16x64xf32> -> vector<16x64xf32>
    %23 = vector.broadcast %21 : vector<1x64xf32> to vector<16x64xf32>
    %24 = arith.addf %22, %23 : vector<16x64xf32>
    %25 = vector.extract_strided_slice %24 {offsets = [0, 0], sizes = [16, 32], strides = [1, 1]} : vector<16x64xf32> to vector<16x32xf32>
    %26 = vector.extract_strided_slice %24 {offsets = [0, 32], sizes = [16, 32], strides = [1, 1]} : vector<16x64xf32> to vector<16x32xf32>
    %c80 = arith.constant 80 : index
    %c0_11 = arith.constant 0 : index
    %27 = vector.load %arg2[%c80, %c0_11] : memref<1048x64xf32, #tpu.memory_space<vmem>>, vector<6x32xf32>
    %c86 = arith.constant 86 : index
    %c0_12 = arith.constant 0 : index
    %28 = vector.load %arg2[%c86, %c0_12] : memref<1048x64xf32, #tpu.memory_space<vmem>>, vector<1x32xf32>
    %cst_13 = arith.constant dense<0.000000e+00> : vector<16x32xf32>
    %29 = tpu.matmul %2, %27, %cst_13 {dimension_numbers = #tpu.dot_dimension_numbers<[1], [0], [0], [1], [0, 0, 1, 1], [], []>} : vector<16x6xf32>, vector<6x32xf32>, vector<16x32xf32> -> vector<16x32xf32>
    %30 = vector.broadcast %28 : vector<1x32xf32> to vector<16x32xf32>
    %31 = arith.addf %29, %30 : vector<16x32xf32>
    %32 = arith.addf %31, %25 : vector<16x32xf32>
    %c0_14 = arith.constant 0 : index
    %c0_15 = arith.constant 0 : index
    %33 = vector.load %arg1[%c0_14, %c0_15] : memref<128x25xf32, #tpu.memory_space<vmem>>, vector<128x25xf32>
    %c128 = arith.constant 128 : index
    %c0_16 = arith.constant 0 : index
    %34 = vector.load %arg2[%c128, %c0_16] : memref<1048x64xf32, #tpu.memory_space<vmem>>, vector<25x32xf32>
    %c153 = arith.constant 153 : index
    %c0_17 = arith.constant 0 : index
    %35 = vector.load %arg2[%c153, %c0_17] : memref<1048x64xf32, #tpu.memory_space<vmem>>, vector<1x32xf32>
    %cst_18 = arith.constant dense<0.000000e+00> : vector<128x32xf32>
    %36 = tpu.matmul %33, %34, %cst_18 {dimension_numbers = #tpu.dot_dimension_numbers<[1], [0], [0], [1], [0, 0, 1, 1], [], []>} : vector<128x25xf32>, vector<25x32xf32>, vector<128x32xf32> -> vector<128x32xf32>
    %37 = vector.broadcast %35 : vector<1x32xf32> to vector<128x32xf32>
    %38 = arith.addf %36, %37 : vector<128x32xf32>
    %c160 = arith.constant 160 : index
    %c0_19 = arith.constant 0 : index
    %39 = vector.load %arg2[%c160, %c0_19] : memref<1048x64xf32, #tpu.memory_space<vmem>>, vector<32x64xf32>
    %c192 = arith.constant 192 : index
    %c0_20 = arith.constant 0 : index
    %40 = vector.load %arg2[%c192, %c0_20] : memref<1048x64xf32, #tpu.memory_space<vmem>>, vector<1x64xf32>
    %cst_21 = arith.constant dense<0.000000e+00> : vector<16x64xf32>
    %41 = tpu.matmul %32, %39, %cst_21 {dimension_numbers = #tpu.dot_dimension_numbers<[1], [0], [0], [1], [0, 0, 1, 1], [], []>} : vector<16x32xf32>, vector<32x64xf32>, vector<16x64xf32> -> vector<16x64xf32>
    %42 = vector.broadcast %40 : vector<1x64xf32> to vector<16x64xf32>
    %43 = arith.addf %41, %42 : vector<16x64xf32>
    %cst_22 = arith.constant 0.000000e+00 : f32
    %44 = vector.broadcast %cst_22 : f32 to vector<16x64xf32>
    %45 = arith.maximumf %43, %44 : vector<16x64xf32>
    %c200 = arith.constant 200 : index
    %c0_23 = arith.constant 0 : index
    %46 = vector.load %arg2[%c200, %c0_23] : memref<1048x64xf32, #tpu.memory_space<vmem>>, vector<64x32xf32>
    %c264 = arith.constant 264 : index
    %c0_24 = arith.constant 0 : index
    %47 = vector.load %arg2[%c264, %c0_24] : memref<1048x64xf32, #tpu.memory_space<vmem>>, vector<1x32xf32>
    %cst_25 = arith.constant dense<0.000000e+00> : vector<16x32xf32>
    %48 = tpu.matmul %45, %46, %cst_25 {dimension_numbers = #tpu.dot_dimension_numbers<[1], [0], [0], [1], [0, 0, 1, 1], [], []>} : vector<16x64xf32>, vector<64x32xf32>, vector<16x32xf32> -> vector<16x32xf32>
    %49 = vector.broadcast %47 : vector<1x32xf32> to vector<16x32xf32>
    %50 = arith.addf %48, %49 : vector<16x32xf32>
    %51 = arith.addf %32, %50 : vector<16x32xf32>
    %c272 = arith.constant 272 : index
    %c0_26 = arith.constant 0 : index
    %52 = vector.load %arg2[%c272, %c0_26] : memref<1048x64xf32, #tpu.memory_space<vmem>>, vector<32x64xf32>
    %c304 = arith.constant 304 : index
    %c0_27 = arith.constant 0 : index
    %53 = vector.load %arg2[%c304, %c0_27] : memref<1048x64xf32, #tpu.memory_space<vmem>>, vector<1x64xf32>
    %cst_28 = arith.constant dense<0.000000e+00> : vector<128x64xf32>
    %54 = tpu.matmul %38, %52, %cst_28 {dimension_numbers = #tpu.dot_dimension_numbers<[1], [0], [0], [1], [0, 0, 1, 1], [], []>} : vector<128x32xf32>, vector<32x64xf32>, vector<128x64xf32> -> vector<128x64xf32>
    %55 = vector.broadcast %53 : vector<1x64xf32> to vector<128x64xf32>
    %56 = arith.addf %54, %55 : vector<128x64xf32>
    %cst_29 = arith.constant 0.000000e+00 : f32
    %57 = vector.broadcast %cst_29 : f32 to vector<128x64xf32>
    %58 = arith.maximumf %56, %57 : vector<128x64xf32>
    %c312 = arith.constant 312 : index
    %c0_30 = arith.constant 0 : index
    %59 = vector.load %arg2[%c312, %c0_30] : memref<1048x64xf32, #tpu.memory_space<vmem>>, vector<64x32xf32>
    %c376 = arith.constant 376 : index
    %c0_31 = arith.constant 0 : index
    %60 = vector.load %arg2[%c376, %c0_31] : memref<1048x64xf32, #tpu.memory_space<vmem>>, vector<1x32xf32>
    %cst_32 = arith.constant dense<0.000000e+00> : vector<128x32xf32>
    %61 = tpu.matmul %58, %59, %cst_32 {dimension_numbers = #tpu.dot_dimension_numbers<[1], [0], [0], [1], [0, 0, 1, 1], [], []>} : vector<128x64xf32>, vector<64x32xf32>, vector<128x32xf32> -> vector<128x32xf32>
    %62 = vector.broadcast %60 : vector<1x32xf32> to vector<128x32xf32>
    %63 = arith.addf %61, %62 : vector<128x32xf32>
    %64 = arith.addf %38, %63 : vector<128x32xf32>
    %c384 = arith.constant 384 : index
    %c0_33 = arith.constant 0 : index
    %65 = vector.load %arg2[%c384, %c0_33] : memref<1048x64xf32, #tpu.memory_space<vmem>>, vector<32x64xf32>
    %c416 = arith.constant 416 : index
    %c0_34 = arith.constant 0 : index
    %66 = vector.load %arg2[%c416, %c0_34] : memref<1048x64xf32, #tpu.memory_space<vmem>>, vector<1x64xf32>
    %cst_35 = arith.constant dense<0.000000e+00> : vector<16x64xf32>
    %67 = tpu.matmul %51, %65, %cst_35 {dimension_numbers = #tpu.dot_dimension_numbers<[1], [0], [0], [1], [0, 0, 1, 1], [], []>} : vector<16x32xf32>, vector<32x64xf32>, vector<16x64xf32> -> vector<16x64xf32>
    %68 = vector.broadcast %66 : vector<1x64xf32> to vector<16x64xf32>
    %69 = arith.addf %67, %68 : vector<16x64xf32>
    %cst_36 = arith.constant 0.000000e+00 : f32
    %70 = vector.broadcast %cst_36 : f32 to vector<16x64xf32>
    %71 = arith.maximumf %69, %70 : vector<16x64xf32>
    %c424 = arith.constant 424 : index
    %c0_37 = arith.constant 0 : index
    %72 = vector.load %arg2[%c424, %c0_37] : memref<1048x64xf32, #tpu.memory_space<vmem>>, vector<64x32xf32>
    %c488 = arith.constant 488 : index
    %c0_38 = arith.constant 0 : index
    %73 = vector.load %arg2[%c488, %c0_38] : memref<1048x64xf32, #tpu.memory_space<vmem>>, vector<1x32xf32>
    %cst_39 = arith.constant dense<0.000000e+00> : vector<16x32xf32>
    %74 = tpu.matmul %71, %72, %cst_39 {dimension_numbers = #tpu.dot_dimension_numbers<[1], [0], [0], [1], [0, 0, 1, 1], [], []>} : vector<16x64xf32>, vector<64x32xf32>, vector<16x32xf32> -> vector<16x32xf32>
    %75 = vector.broadcast %73 : vector<1x32xf32> to vector<16x32xf32>
    %76 = arith.addf %74, %75 : vector<16x32xf32>
    %77 = arith.addf %51, %76 : vector<16x32xf32>
    %c496 = arith.constant 496 : index
    %c0_40 = arith.constant 0 : index
    %78 = vector.load %arg2[%c496, %c0_40] : memref<1048x64xf32, #tpu.memory_space<vmem>>, vector<32x64xf32>
    %c528 = arith.constant 528 : index
    %c0_41 = arith.constant 0 : index
    %79 = vector.load %arg2[%c528, %c0_41] : memref<1048x64xf32, #tpu.memory_space<vmem>>, vector<1x64xf32>
    %cst_42 = arith.constant dense<0.000000e+00> : vector<128x64xf32>
    %80 = tpu.matmul %64, %78, %cst_42 {dimension_numbers = #tpu.dot_dimension_numbers<[1], [0], [0], [1], [0, 0, 1, 1], [], []>} : vector<128x32xf32>, vector<32x64xf32>, vector<128x64xf32> -> vector<128x64xf32>
    %81 = vector.broadcast %79 : vector<1x64xf32> to vector<128x64xf32>
    %82 = arith.addf %80, %81 : vector<128x64xf32>
    %cst_43 = arith.constant 0.000000e+00 : f32
    %83 = vector.broadcast %cst_43 : f32 to vector<128x64xf32>
    %84 = arith.maximumf %82, %83 : vector<128x64xf32>
    %c536 = arith.constant 536 : index
    %c0_44 = arith.constant 0 : index
    %85 = vector.load %arg2[%c536, %c0_44] : memref<1048x64xf32, #tpu.memory_space<vmem>>, vector<64x32xf32>
    %c600 = arith.constant 600 : index
    %c0_45 = arith.constant 0 : index
    %86 = vector.load %arg2[%c600, %c0_45] : memref<1048x64xf32, #tpu.memory_space<vmem>>, vector<1x32xf32>
    %cst_46 = arith.constant dense<0.000000e+00> : vector<128x32xf32>
    %87 = tpu.matmul %84, %85, %cst_46 {dimension_numbers = #tpu.dot_dimension_numbers<[1], [0], [0], [1], [0, 0, 1, 1], [], []>} : vector<128x64xf32>, vector<64x32xf32>, vector<128x32xf32> -> vector<128x32xf32>
    %88 = vector.broadcast %86 : vector<1x32xf32> to vector<128x32xf32>
    %89 = arith.addf %87, %88 : vector<128x32xf32>
    %90 = arith.addf %64, %89 : vector<128x32xf32>
    %91 = arith.addf %77, %26 : vector<16x32xf32>
    %c608 = arith.constant 608 : index
    %c0_47 = arith.constant 0 : index
    %92 = vector.load %arg2[%c608, %c0_47] : memref<1048x64xf32, #tpu.memory_space<vmem>>, vector<32x32xf32>
    %c640 = arith.constant 640 : index
    %c0_48 = arith.constant 0 : index
    %93 = vector.load %arg2[%c640, %c0_48] : memref<1048x64xf32, #tpu.memory_space<vmem>>, vector<1x32xf32>
    %cst_49 = arith.constant dense<0.000000e+00> : vector<16x32xf32>
    %94 = tpu.matmul %91, %92, %cst_49 {dimension_numbers = #tpu.dot_dimension_numbers<[1], [0], [0], [1], [0, 0, 1, 1], [], []>} : vector<16x32xf32>, vector<32x32xf32>, vector<16x32xf32> -> vector<16x32xf32>
    %95 = vector.broadcast %93 : vector<1x32xf32> to vector<16x32xf32>
    %96 = arith.addf %94, %95 : vector<16x32xf32>
    %cst_50 = arith.constant 0.000000e+00 : f32
    %97 = vector.broadcast %cst_50 : f32 to vector<16x32xf32>
    %98 = arith.maximumf %96, %97 : vector<16x32xf32>
    %c648 = arith.constant 648 : index
    %c0_51 = arith.constant 0 : index
    %99 = vector.load %arg2[%c648, %c0_51] : memref<1048x64xf32, #tpu.memory_space<vmem>>, vector<32x32xf32>
    %c680 = arith.constant 680 : index
    %c0_52 = arith.constant 0 : index
    %100 = vector.load %arg2[%c680, %c0_52] : memref<1048x64xf32, #tpu.memory_space<vmem>>, vector<1x32xf32>
    %cst_53 = arith.constant dense<0.000000e+00> : vector<16x32xf32>
    %101 = tpu.matmul %98, %99, %cst_53 {dimension_numbers = #tpu.dot_dimension_numbers<[1], [0], [0], [1], [0, 0, 1, 1], [], []>} : vector<16x32xf32>, vector<32x32xf32>, vector<16x32xf32> -> vector<16x32xf32>
    %102 = vector.broadcast %100 : vector<1x32xf32> to vector<16x32xf32>
    %103 = arith.addf %101, %102 : vector<16x32xf32>
    %104 = arith.addf %77, %103 : vector<16x32xf32>
    %c688 = arith.constant 688 : index
    %c0_54 = arith.constant 0 : index
    %105 = vector.load %arg2[%c688, %c0_54] : memref<1048x64xf32, #tpu.memory_space<vmem>>, vector<32x32xf32>
    %c720 = arith.constant 720 : index
    %c0_55 = arith.constant 0 : index
    %106 = vector.load %arg2[%c720, %c0_55] : memref<1048x64xf32, #tpu.memory_space<vmem>>, vector<1x32xf32>
    %cst_56 = arith.constant dense<0.000000e+00> : vector<128x32xf32>
    %107 = tpu.matmul %90, %105, %cst_56 {dimension_numbers = #tpu.dot_dimension_numbers<[1], [0], [0], [1], [0, 0, 1, 1], [], []>} : vector<128x32xf32>, vector<32x32xf32>, vector<128x32xf32> -> vector<128x32xf32>
    %108 = vector.broadcast %106 : vector<1x32xf32> to vector<128x32xf32>
    %109 = arith.addf %107, %108 : vector<128x32xf32>
    %cst_57 = arith.constant 0.000000e+00 : f32
    %110 = vector.broadcast %cst_57 : f32 to vector<128x32xf32>
    %111 = arith.maximumf %109, %110 : vector<128x32xf32>
    %c728 = arith.constant 728 : index
    %c0_58 = arith.constant 0 : index
    %112 = vector.load %arg2[%c728, %c0_58] : memref<1048x64xf32, #tpu.memory_space<vmem>>, vector<32x32xf32>
    %c760 = arith.constant 760 : index
    %c0_59 = arith.constant 0 : index
    %113 = vector.load %arg2[%c760, %c0_59] : memref<1048x64xf32, #tpu.memory_space<vmem>>, vector<1x32xf32>
    %cst_60 = arith.constant dense<0.000000e+00> : vector<128x32xf32>
    %114 = tpu.matmul %111, %112, %cst_60 {dimension_numbers = #tpu.dot_dimension_numbers<[1], [0], [0], [1], [0, 0, 1, 1], [], []>} : vector<128x32xf32>, vector<32x32xf32>, vector<128x32xf32> -> vector<128x32xf32>
    %115 = vector.broadcast %113 : vector<1x32xf32> to vector<128x32xf32>
    %116 = arith.addf %114, %115 : vector<128x32xf32>
    %117 = arith.addf %90, %116 : vector<128x32xf32>
    %c768 = arith.constant 768 : index
    %c0_61 = arith.constant 0 : index
    %118 = vector.load %arg2[%c768, %c0_61] : memref<1048x64xf32, #tpu.memory_space<vmem>>, vector<32x7xf32>
    %c800 = arith.constant 800 : index
    %c0_62 = arith.constant 0 : index
    %119 = vector.load %arg2[%c800, %c0_62] : memref<1048x64xf32, #tpu.memory_space<vmem>>, vector<1x7xf32>
    %cst_63 = arith.constant dense<0.000000e+00> : vector<16x7xf32>
    %120 = tpu.matmul %104, %118, %cst_63 {dimension_numbers = #tpu.dot_dimension_numbers<[1], [0], [0], [1], [0, 0, 1, 1], [], []>} : vector<16x32xf32>, vector<32x7xf32>, vector<16x7xf32> -> vector<16x7xf32>
    %121 = vector.broadcast %119 : vector<1x7xf32> to vector<16x7xf32>
    %122 = arith.addf %120, %121 : vector<16x7xf32>
    %123 = arith.addf %3, %122 : vector<16x7xf32>
    %124 = arith.addf %104, %26 : vector<16x32xf32>
    %c808 = arith.constant 808 : index
    %c0_64 = arith.constant 0 : index
    %125 = vector.load %arg2[%c808, %c0_64] : memref<1048x64xf32, #tpu.memory_space<vmem>>, vector<32x32xf32>
    %c840 = arith.constant 840 : index
    %c0_65 = arith.constant 0 : index
    %126 = vector.load %arg2[%c840, %c0_65] : memref<1048x64xf32, #tpu.memory_space<vmem>>, vector<1x32xf32>
    %cst_66 = arith.constant dense<0.000000e+00> : vector<16x32xf32>
    %127 = tpu.matmul %124, %125, %cst_66 {dimension_numbers = #tpu.dot_dimension_numbers<[1], [0], [0], [1], [0, 0, 1, 1], [], []>} : vector<16x32xf32>, vector<32x32xf32>, vector<16x32xf32> -> vector<16x32xf32>
    %128 = vector.broadcast %126 : vector<1x32xf32> to vector<16x32xf32>
    %129 = arith.addf %127, %128 : vector<16x32xf32>
    %cst_67 = arith.constant 0.000000e+00 : f32
    %130 = vector.broadcast %cst_67 : f32 to vector<16x32xf32>
    %131 = arith.maximumf %129, %130 : vector<16x32xf32>
    %c848 = arith.constant 848 : index
    %c0_68 = arith.constant 0 : index
    %132 = vector.load %arg2[%c848, %c0_68] : memref<1048x64xf32, #tpu.memory_space<vmem>>, vector<32x32xf32>
    %c880 = arith.constant 880 : index
    %c0_69 = arith.constant 0 : index
    %133 = vector.load %arg2[%c880, %c0_69] : memref<1048x64xf32, #tpu.memory_space<vmem>>, vector<1x32xf32>
    %cst_70 = arith.constant dense<0.000000e+00> : vector<16x32xf32>
    %134 = tpu.matmul %131, %132, %cst_70 {dimension_numbers = #tpu.dot_dimension_numbers<[1], [0], [0], [1], [0, 0, 1, 1], [], []>} : vector<16x32xf32>, vector<32x32xf32>, vector<16x32xf32> -> vector<16x32xf32>
    %135 = vector.broadcast %133 : vector<1x32xf32> to vector<16x32xf32>
    %136 = arith.addf %134, %135 : vector<16x32xf32>
    %137 = arith.addf %104, %136 : vector<16x32xf32>
    %c888 = arith.constant 888 : index
    %c0_71 = arith.constant 0 : index
    %138 = vector.load %arg2[%c888, %c0_71] : memref<1048x64xf32, #tpu.memory_space<vmem>>, vector<32x32xf32>
    %c920 = arith.constant 920 : index
    %c0_72 = arith.constant 0 : index
    %139 = vector.load %arg2[%c920, %c0_72] : memref<1048x64xf32, #tpu.memory_space<vmem>>, vector<1x32xf32>
    %cst_73 = arith.constant dense<0.000000e+00> : vector<128x32xf32>
    %140 = tpu.matmul %117, %138, %cst_73 {dimension_numbers = #tpu.dot_dimension_numbers<[1], [0], [0], [1], [0, 0, 1, 1], [], []>} : vector<128x32xf32>, vector<32x32xf32>, vector<128x32xf32> -> vector<128x32xf32>
    %141 = vector.broadcast %139 : vector<1x32xf32> to vector<128x32xf32>
    %142 = arith.addf %140, %141 : vector<128x32xf32>
    %cst_74 = arith.constant 0.000000e+00 : f32
    %143 = vector.broadcast %cst_74 : f32 to vector<128x32xf32>
    %144 = arith.maximumf %142, %143 : vector<128x32xf32>
    %c928 = arith.constant 928 : index
    %c0_75 = arith.constant 0 : index
    %145 = vector.load %arg2[%c928, %c0_75] : memref<1048x64xf32, #tpu.memory_space<vmem>>, vector<32x32xf32>
    %c960 = arith.constant 960 : index
    %c0_76 = arith.constant 0 : index
    %146 = vector.load %arg2[%c960, %c0_76] : memref<1048x64xf32, #tpu.memory_space<vmem>>, vector<1x32xf32>
    %cst_77 = arith.constant dense<0.000000e+00> : vector<128x32xf32>
    %147 = tpu.matmul %144, %145, %cst_77 {dimension_numbers = #tpu.dot_dimension_numbers<[1], [0], [0], [1], [0, 0, 1, 1], [], []>} : vector<128x32xf32>, vector<32x32xf32>, vector<128x32xf32> -> vector<128x32xf32>
    %148 = vector.broadcast %146 : vector<1x32xf32> to vector<128x32xf32>
    %149 = arith.addf %147, %148 : vector<128x32xf32>
    %150 = arith.addf %117, %149 : vector<128x32xf32>
    %c968 = arith.constant 968 : index
    %c0_78 = arith.constant 0 : index
    %151 = vector.load %arg2[%c968, %c0_78] : memref<1048x64xf32, #tpu.memory_space<vmem>>, vector<32x13xf32>
    %c1000 = arith.constant 1000 : index
    %c0_79 = arith.constant 0 : index
    %152 = vector.load %arg2[%c1000, %c0_79] : memref<1048x64xf32, #tpu.memory_space<vmem>>, vector<1x13xf32>
    %cst_80 = arith.constant dense<0.000000e+00> : vector<16x13xf32>
    %153 = tpu.matmul %137, %151, %cst_80 {dimension_numbers = #tpu.dot_dimension_numbers<[1], [0], [0], [1], [0, 0, 1, 1], [], []>} : vector<16x32xf32>, vector<32x13xf32>, vector<16x13xf32> -> vector<16x13xf32>
    %154 = vector.broadcast %152 : vector<1x13xf32> to vector<16x13xf32>
    %155 = arith.addf %153, %154 : vector<16x13xf32>
    %156 = vector.extract_strided_slice %155 {offsets = [0, 0], sizes = [16, 7], strides = [1, 1]} : vector<16x13xf32> to vector<16x7xf32>
    %157 = arith.addf %123, %156 : vector<16x7xf32>
    %158 = vector.extract_strided_slice %155 {offsets = [0, 7], sizes = [16, 6], strides = [1, 1]} : vector<16x13xf32> to vector<16x6xf32>
    %159 = tpu.concatenate %157, %158 in 1 : vector<16x7xf32>, vector<16x6xf32> -> vector<16x13xf32>
    %c0_81 = arith.constant 0 : index
    %c0_82 = arith.constant 0 : index
    %160 = vector.load %arg3[%c0_81, %c0_82] : memref<16x13xf32, #tpu.memory_space<vmem>>, vector<16x13xf32>
    tpu.vector_store %arg3[%c0_81, %c0_82], %159 {strides = array<i32>} : memref<16x13xf32, #tpu.memory_space<vmem>>, vector<16x13xf32>,
    %c1008 = arith.constant 1008 : index
    %c0_83 = arith.constant 0 : index
    %161 = vector.load %arg2[%c1008, %c0_83] : memref<1048x64xf32, #tpu.memory_space<vmem>>, vector<32x16xf32>
    %c1040 = arith.constant 1040 : index
    %c0_84 = arith.constant 0 : index
    %162 = vector.load %arg2[%c1040, %c0_84] : memref<1048x64xf32, #tpu.memory_space<vmem>>, vector<1x16xf32>
    %cst_85 = arith.constant dense<0.000000e+00> : vector<128x16xf32>
    %163 = tpu.matmul %150, %161, %cst_85 {dimension_numbers = #tpu.dot_dimension_numbers<[1], [0], [0], [1], [0, 0, 1, 1], [], []>} : vector<128x32xf32>, vector<32x16xf32>, vector<128x16xf32> -> vector<128x16xf32>
    %164 = vector.broadcast %162 : vector<1x16xf32> to vector<128x16xf32>
    %165 = arith.addf %163, %164 : vector<128x16xf32>
    %c0_86 = arith.constant 0 : index
    %c0_87 = arith.constant 0 : index
    %166 = vector.load %arg4[%c0_86, %c0_87] : memref<128x16xf32, #tpu.memory_space<vmem>>, vector<128x16xf32>
    tpu.vector_store %arg4[%c0_86, %c0_87], %165 {strides = array<i32>} : memref<128x16xf32, #tpu.memory_space<vmem>>, vector<128x16xf32>,
    return
  }
}

</mosaic_0001>

<bundles_post_ra>
// kernel: reconstruct_affine_forward.1
= control target key start
LH: loop header
LB: loop body
LE: loop exit
PB: predicated region body
PF: predicated region fallthrough
CT: control target
= control target key end

     0   :  { %vm25_vm0 = vcmask 261120   ;;  %s3464_s0 = inlined_call_operand.vmem [shape: f32[16,45], index: 0, kind: input, shape index: {}]   ;;  %s3465_s1 = inlined_call_operand.vmem [shape: f32[128,25], index: 1, kind: input, shape index: {}]   ;;  %s3466_s2 = inlined_call_operand.vmem [shape: f32[1048,64], index: 2, kind: input, shape index: {}]   ;;  %s3467_s3 = inlined_call_operand.vmem [shape: f32[16,13], index: 3, kind: output, shape index: {0}]   ;;  %s3468_s4 = inlined_call_operand.hbm [shape: f32[128,16], index: 4, kind: output, shape index: {1}]  }
   0x1   :  { %v22_v0 = vld [vmem:[%s3466_s2 + $0x18] sm:$0xff]  ;;  %v21_v1 = vld [vmem:[%s3466_s2 + $0x10] sm:$0xff]  ;;  %v20_v2 = vld [vmem:[%s3466_s2 + $0x8] sm:$0xff] }
   0x2   :  { %44 = vmatpush.msra.mxu0 %v22_v0  ;;  %v19_v3 = vld [vmem:[%s3466_s2] sm:$0xff] }
   0x3   :  { %v17_v4 = vld [vmem:[%s3464_s0] sm:$0xff] }
   0x4   :  { %45 = vmatpush.msra.mxu0 %v21_v1 }
   0x6   :  { %46 = vmatpush.msra.mxu0 %v20_v2 }
   0x8   :  { %47 = vmatpush.msra.mxu0 %v19_v3 }
   0x9   :  { %2013 = vmatmul.msk.f32.vlgmr.msra.gmra.mxu0 %vm25_vm0, %v17_v4 }
   0xa   :  { %10 = vsyncpa [#allocation3], 0  ;;  %v18_v5 = vld [vmem:[%s3464_s0 + $0x8] sm:$0xff]  ;;  %s2283_s27 = smov 96   ;;  %v98_v6 = vld [vmem:[%s3466_s2 + $0x40] sm:$0xff]  ;;  %vm177_vm9 = vcmask 1045504  }
   0xb   :  { %168 = vrot.lane.b32.xlu0 %v17_v4, %s2283_s27  ;;  %119 = vmatpush.msra.mxu1 %v98_v6  ;;  %v97_v7 = vld [vmem:[%s3466_s2 + $0x38] sm:$0xff]  ;;  %v2223_v8 = vld [vmem:[%s3466_s2 + $0x20] ss:$0 sm:$0xff]  ;;  %v96_v9 = vld [vmem:[%s3466_s2 + $0x30] sm:$0xff]  ;;  %vm172_vm10 = vcmask 48128   ;;  %vm277_vm11 = vcmask 1040384  }
   0xc   :  { %v95_v10 = vld [vmem:[%s3466_s2 + $0x28] sm:$0xff]  ;;  %v133_v16 = vld [vmem:[%s3466_s2 + $0x70] sm:$0xff]  ;;  %v131_v45 = vld [vmem:[%s3466_s2 + $0x60] sm:$0xff]  ;;  %vm228_vm12 = vcmask 203776   ;;  %vm393_vm13 = vcmask 523264   ;;  %s2284_s15 = smov 38  }
   0xd   :  { %120 = vmatpush.msra.mxu1 %v97_v7  ;;  %v132_v17 = vld [vmem:[%s3466_s2 + $0x68] sm:$0xff]  ;;  %154 = vmatpush.msra.mxu2 %v133_v16  ;;  %v130_v46 = vld [vmem:[%s3466_s2 + $0x58] sm:$0xff]  ;;  %v165_v47 = vld [vmem:[%s3466_s2 + $0x50] sm:$0x3f]  ;;  %s2285_s28 = smov 90   ;;  %vm1974_vm14 = vcmask 130048  }
   0xe   :  { %2021 = vmatpush.msk.msra.mxu3 %vm177_vm9, %v165_v47  ;;  %v225_v50 = vld [vmem:[%s3466_s2 + $0x98] sm:$0x1]  ;;  %v224_v51 = vld [vmem:[%s3466_s2 + $0x90] sm:$0xff]  ;;  %v223_v52 = vld [vmem:[%s3466_s2 + $0x88] sm:$0xff]  ;;  %vm1849_vm15 = vcmask 56320   ;;  %s2286_s8 = smov [#allocation2]  }
   0xf   :  { %121 = vmatpush.msra.mxu1 %v96_v9  ;;  %155 = vmatpush.msra.mxu2 %v132_v17  ;;  %v222_v53 = vld [vmem:[%s3466_s2 + $0x80] sm:$0xff]  ;;  %v208_v54 = vld [vmem:[%s3465_s1 + $0x10] sm:$0xff]  ;;  %v2224_v55 = vld [vmem:[%s3466_s2 + $0x48] ss:$0 sm:$0xff]  ;;  %s1997_s9 = sshll.u32 %s2286_s8, 4  ;;  %s1999_s11 = sshll.u32 %s3468_s4, 4  ;;  %s1998_s9 = int_to_ptr.vmem [resolvable:$true] %s1997_s9  ;;  %s2000_s11 = int_to_ptr.hbm [resolvable:$true] %s1999_s11 }
  0x10   :  { %2205 = vmatpush.msk.msrb.mxu3 %vm277_vm11, %v225_v50  ;;  %v209_v58 = vld [vmem:[%s3465_s1 + $0x18] sm:$0xff]  ;;  %v210_v61 = vld [vmem:[%s3465_s1 + $0x20] sm:$0xff]  ;;  %v211_v63 = vld [vmem:[%s3465_s1 + $0x28] sm:$0xff]  ;;  %s2288_s12 = smov 8  }
  0x11   :  { %2014 = vmatmul.msk.f32.gmra.mxu0 %vm25_vm0, %v18_v5  ;;  %122 = vmatpush.msra.mxu1 %v95_v10  ;;  %v206_v62 = vld [vmem:[%s3465_s1] sm:$0xff]  ;;  %v207_v0 = vld [vmem:[%s3465_s1 + $0x8] sm:$0xff]  ;;  %v212_v1 = vld [vmem:[%s3465_s1 + $0x30] sm:$0xff] }
  0x12   :  { %156 = vmatpush.msra.mxu2 %v131_v45  ;;  %2206 = vmatpush.msrb.mxu3 %v224_v51  ;;  %v213_v2 = vld [vmem:[%s3465_s1 + $0x38] sm:$0xff]  ;;  %v214_v3 = vld [vmem:[%s3465_s1 + $0x40] sm:$0xff]  ;;  %v215_v4 = vld [vmem:[%s3465_s1 + $0x48] sm:$0xff] }
  0x13   :  { %170 = vrot.lane.b32.xlu0 %v18_v5, %s2283_s27  ;;  %v349_v5 = vld [vmem:[%s3466_s2 + $0xb8] sm:$0xff]  ;;  %v348_v6 = vld [vmem:[%s3466_s2 + $0xb0] sm:$0xff]  ;;  %v218_v10 = vld [vmem:[%s3465_s1 + $0x60] sm:$0xff] }
  0x14   :  { %157 = vmatpush.msra.mxu2 %v130_v46  ;;  %2207 = vmatpush.msrb.mxu3 %v223_v52  ;;  %v216_v7 = vld [vmem:[%s3465_s1 + $0x50] sm:$0xff]  ;;  %v217_v9 = vld [vmem:[%s3465_s1 + $0x58] sm:$0xff]  ;;  %v427_v16 = vld [vmem:[%s3466_s2 + $0x120] sm:$0xff] }
  0x15   :  { %370 = vmatpush.msrb.mxu0 %v349_v5  ;;  %v426_v17 = vld [vmem:[%s3466_s2 + $0x118] sm:$0xff] }
  0x16   :  { %2024 = vmatpush.msk.msrb.mxu2 %vm277_vm11, %v225_v50  ;;  %2208 = vmatpush.msrb.mxu3 %v222_v53  ;;  %v564_v5 = vld [vmem:[%s3466_s2 + $0x158] sm:$0xff] }
  0x17   :  { %371 = vmatpush.msrb.mxu0 %v348_v6 }
  0x18   :  { %294 = vmatpush.msrb.mxu2 %v224_v51 }
  0x1a   :  { %295 = vmatpush.msrb.mxu2 %v223_v52  ;;  %v390_v52 = vld [vmem:[%s3466_s2 + $0x100] sm:$0xff] }
  0x1b   :  { %408 = vmatpush.msrb.mxu1 %v390_v52 }
  0x1c   :  { %296 = vmatpush.msrb.mxu2 %v222_v53  ;;  %v389_v53 = vld [vmem:[%s3466_s2 + $0xf8] sm:$0xff] }
  0x1d   :  { %409 = vmatpush.msrb.mxu1 %v389_v53 }
  0x7d   :  { %v169_v48 = vpop.permute.xlu0 %168 }
  0x7e   :  { %2022 = vmatmul.msk.f32.vlgmr.msra.gmra.mxu3 %vm172_vm10, %v169_v48 }
  0x85   :  { %v171_v49 = vpop.permute.xlu0 %170 }
  0x86   :  { %v49_v11 = vpop.f32.mrf.mxu0  ;;  %2023 = vmatmul.msk.f32.gmra.mxu3 %vm172_vm10, %v171_v49 }
  0x87   :  { %v50_v12 = vadd.f32 %v2223_v8, %v49_v11  ;;  %v219_v11 = vld [vmem:[%s3465_s1 + $0x68] sm:$0xff] }
  0x89   :  { %v2015_v13 = vmul.f32 -1.442695, %v50_v12 }
  0x8b   :  { %2247 = vpow2.f32 %v2015_v13  ;;  %v346_v13 = vld [vmem:[%s3466_s2 + $0xa0] sm:$0xff] }
  0x8e   :  { %v52_v14 = vpop.f32.mrf.mxu0  ;;  %2027 = vmatmul.msk.f32.vlgmr.msrb.gmra.mxu3 %vm228_vm12, %v208_v54 }
  0x8f   :  { %v53_v15 = vadd.f32 %v2223_v8, %v52_v14  ;;  %v347_v8 = vld [vmem:[%s3466_s2 + $0xa8] sm:$0xff]  ;;  %v221_v14 = vld [vmem:[%s3465_s1 + $0x78] sm:$0xff] }
  0x90   :  { %372 = vmatpush.msrb.mxu0 %v347_v8  ;;  %v562_v8 = vld [vmem:[%s3466_s2 + $0x148] sm:$0xff] }
  0x91   :  { %v2248_v18 = vpop.eup %2247  ;;  %v2016_v19 = vmul.f32 -1.442695, %v53_v15 }
  0x92   :  { %v61_v20 = vadd.f32 1.0, %v2248_v18  ;;  %373 = vmatpush.msrb.mxu0 %v346_v13 }
  0x93   :  { %2249 = vpow2.f32 %v2016_v19  ;;  %v425_v19 = vld [vmem:[%s3466_s2 + $0x110] sm:$0xff] }
  0x94   :  { %2251 = vrcp.f32 %v61_v20  ;;  %v74_v26 = vand.u32 2147483648, %v61_v20  ;;  %v72_v28 = vand.u32 2147483647, %v61_v20  ;;  %vm68_vm2 = vweird.f32 %v61_v20 }
  0x96   :  { %v75_v31 = vor.u32 1.1754944e-38, %v74_v26  ;;  %vm73_vm4 = vcmp.eq.f32.partialorder %v72_v28, 8.507059e+37  ;;  %2028 = vmatmul.msk.f32.gmra.mxu3 %vm228_vm12, %v209_v58  ;;  %v386_v58 = vld [vmem:[%s3466_s2 + $0xe0] sm:$0xff] }
  0x99   :  { %v2250_v21 = vpop.eup %2249 }
  0x9a   :  { %v2252_v22 = vpop.eup %2251  ;;  %v62_v23 = vadd.f32 1.0, %v2250_v21  ;;  %v2225_v21 = vld [vmem:[%s3466_s2 + $0x56] ss:$0 sm:$0xff] }
  0x9b   :  { %v64_v24 = vmul.f32 %v2252_v22, %v61_v20  ;;  %vm69_vm1 = vweird.f32 %v2252_v22 }
  0x9c   :  { %2253 = vrcp.f32 %v62_v23  ;;  %vm70_vm3 = vmor %vm68_vm2, %vm69_vm1  ;;  %v89_v37 = vand.u32 2147483648, %v62_v23  ;;  %v87_v39 = vand.u32 2147483647, %v62_v23  ;;  %vm83_vm6 = vweird.f32 %v62_v23 }
  0x9d   :  { %v65_v25 = vsub.f32 1.0, %v64_v24 }
  0x9e   :  { %v90_v41 = vor.u32 1.1754944e-38, %v89_v37  ;;  %vm88_vm8 = vcmp.eq.f32.partialorder %v87_v39, 8.507059e+37  ;;  %2029 = vmatmul.msk.f32.gmra.mxu3 %vm228_vm12, %v210_v61  ;;  %v384_v61 = vld [vmem:[%s3466_s2 + $0xd0] sm:$0xff] }
  0x9f   :  { %v66_v27 = vmul.f32 %v2252_v22, %v65_v25 }
  0xa1   :  { %v67_v29 = vadd.f32 %v2252_v22, %v66_v27 }
  0xa2   :  { %v2254_v30 = vpop.eup %2253 }
  0xa3   :  { %v71_v32 = vsel %vm70_vm3, %v2252_v22, %v67_v29  ;;  %v79_v33 = vmul.f32 %v2254_v30, %v62_v23  ;;  %vm84_vm5 = vweird.f32 %v2254_v30  ;;  %v2226_v22 = vld [vmem:[%s3466_s2 + $0x78] ss:$0 sm:$0xff] }
  0xa4   :  { %v76_v34 = vsel %vm73_vm4, %v75_v31, %v71_v32  ;;  %vm85_vm7 = vmor %vm83_vm6, %vm84_vm5 }
  0xa5   :  { %v93_v35 = vmul.f32 %v76_v34, %v50_v12  ;;  %v80_v36 = vsub.f32 1.0, %v79_v33  ;;  %v220_v12 = vld [vmem:[%s3465_s1 + $0x70] sm:$0xff]  ;;  %v2492_v33 = vld [vmem:[%s3466_s2 + $0x99] ss:$0 sm:$0xff] }
  0xa6   :  { %2030 = vmatmul.msk.f32.gmra.mxu3 %vm228_vm12, %v211_v63 }
  0xa7   :  { %v81_v38 = vmul.f32 %v2254_v30, %v80_v36  ;;  %2017 = vmatmul.msk.f32.vlgmr.msra.gmra.mxu1 %vm25_vm0, %v93_v35 }
  0xa9   :  { %v82_v40 = vadd.f32 %v2254_v30, %v81_v38 }
  0xab   :  { %v86_v42 = vsel %vm85_vm7, %v2254_v30, %v82_v40 }
  0xac   :  { %v91_v43 = vsel %vm88_vm8, %v90_v41, %v86_v42 }
  0xad   :  { %v94_v44 = vmul.f32 %v91_v43, %v53_v15  ;;  %v428_v15 = vld [vmem:[%s3466_s2 + $0x128] sm:$0xff] }
  0xae   :  { %2031 = vmatmul.msk.f32.gmra.mxu3 %vm228_vm12, %v212_v1  ;;  %v567_v1 = vld [vmem:[%s3466_s2 + $0x170] sm:$0xff] }
  0xaf   :  { %2018 = vmatmul.msk.f32.gmra.mxu1 %vm25_vm0, %v94_v44  ;;  %626 = vmatpush.msra.mxu0 %v567_v1 }
  0xb6   :  { %2032 = vmatmul.msk.f32.gmra.mxu3 %vm228_vm12, %v213_v2  ;;  %v566_v2 = vld [vmem:[%s3466_s2 + $0x168] sm:$0xff] }
  0xb7   :  { %627 = vmatpush.msra.mxu0 %v566_v2 }
  0xbe   :  { %2033 = vmatmul.msk.f32.gmra.mxu3 %vm228_vm12, %v214_v3 }
  0xc6   :  { %2034 = vmatmul.msk.f32.gmra.mxu3 %vm228_vm12, %v215_v4  ;;  %v565_v4 = vld [vmem:[%s3466_s2 + $0x160] sm:$0xff] }
  0xc7   :  { %628 = vmatpush.msra.mxu0 %v565_v4 }
  0xc9   :  { %629 = vmatpush.msra.mxu0 %v564_v5 }
  0xce   :  { %2035 = vmatmul.msk.f32.gmra.mxu3 %vm228_vm12, %v216_v7  ;;  %v563_v7 = vld [vmem:[%s3466_s2 + $0x150] sm:$0xff] }
  0xcf   :  { %630 = vmatpush.msra.mxu0 %v563_v7 }
  0xd1   :  { %631 = vmatpush.msra.mxu0 %v562_v8 }
  0xd6   :  { %2036 = vmatmul.msk.f32.gmra.mxu3 %vm228_vm12, %v217_v9 }
  0xde   :  { %2037 = vmatmul.msk.f32.gmra.mxu3 %vm228_vm12, %v218_v10  ;;  %v561_v10 = vld [vmem:[%s3466_s2 + $0x140] sm:$0xff] }
  0xdf   :  { %632 = vmatpush.msra.mxu0 %v561_v10 }
  0xe6   :  { %2038 = vmatmul.msk.f32.gmra.mxu3 %vm228_vm12, %v219_v11  ;;  %v560_v11 = vld [vmem:[%s3466_s2 + $0x138] sm:$0xff] }
  0xe7   :  { %633 = vmatpush.msra.mxu0 %v560_v11 }
  0xee   :  { %2039 = vmatmul.msk.f32.gmra.mxu3 %vm228_vm12, %v220_v12 }
  0xf6   :  { %2040 = vmatmul.msk.f32.gmra.mxu3 %vm228_vm12, %v221_v14  ;;  %v2228_v14 = vld [vmem:[%s3466_s2 + $0xc0] ss:$0 sm:$0xff] }
 0x101   :  { %v198_v18 = vpop.f32.mrf.mxu3 }
 0x102   :  { %v199_v23 = vadd.f32 %v2225_v21, %v198_v18 }
 0x109   :  { %v201_v20 = vpop.f32.mrf.mxu3 }
 0x10a   :  { %v202_v28 = vadd.f32 %v2225_v21, %v201_v20 }
 0x111   :  { %v304_v26 = vpop.f32.mrf.mxu3 }
 0x112   :  { %v2505_v39 = vadd.f32 %v2492_v33, %v304_v26 }
 0x119   :  { %v307_v32 = vpop.f32.mrf.mxu3 }
 0x11a   :  { %v2510_v41 = vadd.f32 %v2492_v33, %v307_v32 }
 0x121   :  { %v310_v36 = vpop.f32.mrf.mxu3 }
 0x122   :  { %v2515_v43 = vadd.f32 %v2492_v33, %v310_v36 }
 0x124   :  { %v124_v56 = vpop.f32.mrf.mxu1 }
 0x125   :  { %v125_v57 = vadd.f32 %v2224_v55, %v124_v56  ;;  %v387_v56 = vld [vmem:[%s3466_s2 + $0xe8] sm:$0xff] }
 0x127   :  { %2019 = vmatmul.msk.f32.vlgmr.msra.gmra.mxu2 %vm25_vm0, %v125_v57 }
 0x128   :  { %491 = vmatpush.msra.mxu2 %v428_v15 }
 0x129   :  { %v313_v40 = vpop.f32.mrf.mxu3 }
 0x12a   :  { %492 = vmatpush.msra.mxu2 %v427_v16  ;;  %v2520_v45 = vadd.f32 %v2492_v33, %v313_v40 }
 0x12c   :  { %v127_v59 = vpop.f32.mrf.mxu1  ;;  %493 = vmatpush.msra.mxu2 %v426_v17 }
 0x12d   :  { %v128_v60 = vadd.f32 %v2224_v55, %v127_v59  ;;  %v388_v55 = vld [vmem:[%s3466_s2 + $0xf0] sm:$0xff]  ;;  %v385_v59 = vld [vmem:[%s3466_s2 + $0xd8] sm:$0xff] }
 0x12e   :  { %494 = vmatpush.msra.mxu2 %v425_v19  ;;  %410 = vmatpush.msrb.mxu1 %v388_v55 }
 0x12f   :  { %2020 = vmatmul.msk.f32.gmra.mxu2 %vm25_vm0, %v128_v60 }
 0x130   :  { %411 = vmatpush.msrb.mxu1 %v387_v56 }
 0x131   :  { %v316_v42 = vpop.f32.mrf.mxu3 }
 0x132   :  { %v2525_v47 = vadd.f32 %v2492_v33, %v316_v42  ;;  %412 = vmatpush.msrb.mxu1 %v386_v58 }
 0x134   :  { %413 = vmatpush.msrb.mxu1 %v385_v59 }
 0x136   :  { %414 = vmatpush.msrb.mxu1 %v384_v61 }
 0x137   :  { %2025 = vmatmul.msk.f32.vlgmr.msrb.gmra.mxu2 %vm228_vm12, %v206_v62  ;;  %v383_v62 = vld [vmem:[%s3466_s2 + $0xc8] sm:$0xff] }
 0x138   :  { %415 = vmatpush.msrb.mxu1 %v383_v62  ;;  %2209 = vmatpush.msrb.mxu2 %v567_v1  ;;  %v702_v1 = vld [vmem:[%s3466_s2 + $0x198] sm:$0xff] }
 0x139   :  { %v319_v44 = vpop.f32.mrf.mxu3 }
 0x13a   :  { %v2530_v48 = vadd.f32 %v2492_v33, %v319_v44  ;;  %2210 = vmatpush.msrb.mxu2 %v566_v2  ;;  %723 = vmatpush.msra.mxu1 %v702_v1  ;;  %v701_v2 = vld [vmem:[%s3466_s2 + $0x190] sm:$0xff] }
 0x13c   :  { %2211 = vmatpush.msrb.mxu2 %v565_v4  ;;  %724 = vmatpush.msra.mxu1 %v701_v2 }
 0x13e   :  { %2212 = vmatpush.msrb.mxu2 %v564_v5 }
 0x13f   :  { %2026 = vmatmul.msk.f32.gmra.mxu2 %vm228_vm12, %v207_v0 }
 0x140   :  { %2213 = vmatpush.msrb.mxu2 %v563_v7  ;;  %v700_v7 = vld [vmem:[%s3466_s2 + $0x188] sm:$0xff] }
 0x141   :  { %v322_v46 = vpop.f32.mrf.mxu3  ;;  %725 = vmatpush.msra.mxu1 %v700_v7 }
 0x142   :  { %v2535_v50 = vadd.f32 %v2492_v33, %v322_v46  ;;  %2214 = vmatpush.msrb.mxu2 %v562_v8 }
 0x144   :  { %2215 = vmatpush.msrb.mxu2 %v561_v10 }
 0x146   :  { %2216 = vmatpush.msrb.mxu2 %v560_v11  ;;  %v699_v11 = vld [vmem:[%s3466_s2 + $0x180] sm:$0xff] }
 0x147   :  { %726 = vmatpush.msra.mxu1 %v699_v11 }
 0x149   :  { %v325_v49 = vpop.f32.mrf.mxu3 }
 0x14a   :  { %v2546_v54 = vadd.f32 %v2492_v33, %v325_v49 }
 0x151   :  { %v328_v51 = vpop.f32.mrf.mxu3 }
 0x152   :  { %v2563_v60 = vadd.f32 %v2492_v33, %v328_v51 }
 0x159   :  { %v331_v57 = vpop.f32.mrf.mxu3 }
 0x15a   :  { %v2574_v0 = vadd.f32 %v2492_v33, %v331_v57 }
 0x161   :  { %v334_v63 = vpop.f32.mrf.mxu3 }
 0x162   :  { %v2585_v3 = vadd.f32 %v2492_v33, %v334_v63 }
 0x169   :  { %v337_v6 = vpop.f32.mrf.mxu3 }
 0x16a   :  { %v2602_v9 = vadd.f32 %v2492_v33, %v337_v6 }
 0x171   :  { %v340_v12 = vpop.f32.mrf.mxu3 }
 0x172   :  { %v2613_v13 = vadd.f32 %v2492_v33, %v340_v12 }
 0x179   :  { %v343_v17 = vpop.f32.mrf.mxu3 }
 0x17a   :  { %v2622_v19 = vadd.f32 %v2492_v33, %v343_v17 }
 0x1aa   :  { %v159_v24 = vpop.f32.mrf.mxu2 }
 0x1ab   :  { %v160_v25 = vadd.f32 %v2226_v22, %v159_v24 }
 0x1ad   :  { %1053 = vrot.lane.b32.xlu1 %v160_v25, %s2283_s27  ;;  %v2480_v27 = vadd.f32 %v199_v23, %v160_v25  ;;  %v2630_v23 = vld [vmem:[%s3466_s2 + $0x130] ss:$0 sm:$0xff] }
 0x1af   :  { %2041 = vmatmul.msk.f32.vlgmr.msrb.gmra.mxu0 %vm25_vm0, %v2480_v27 }
 0x1b2   :  { %v162_v29 = vpop.f32.mrf.mxu2 }
 0x1b3   :  { %v163_v30 = vadd.f32 %v2226_v22, %v162_v29 }
 0x1b5   :  { %v2484_v31 = vadd.f32 %v202_v28, %v163_v30  ;;  %1055 = vrot.lane.b32.xlu1 %v163_v30, %s2283_s27 }
 0x1b7   :  { %2042 = vmatmul.msk.f32.gmra.mxu0 %vm25_vm0, %v2484_v31 }
 0x1ba   :  { %v298_v34 = vpop.f32.mrf.mxu2 }
 0x1bb   :  { %v2495_v35 = vadd.f32 %v2492_v33, %v298_v34 }
 0x1bd   :  { %2045 = vmatmul.msk.f32.vlgmr.msra.gmra.mxu2 %vm25_vm0, %v2495_v35 }
 0x1c2   :  { %v301_v37 = vpop.f32.mrf.mxu2 }
 0x1c3   :  { %v2500_v38 = vadd.f32 %v2492_v33, %v301_v37 }
 0x1c5   :  { %2046 = vmatmul.msk.f32.gmra.mxu2 %vm25_vm0, %v2500_v38 }
 0x1cd   :  { %2047 = vmatmul.msk.f32.gmra.mxu2 %vm25_vm0, %v2505_v39 }
 0x1d5   :  { %2048 = vmatmul.msk.f32.gmra.mxu2 %vm25_vm0, %v2510_v41 }
 0x1dd   :  { %2049 = vmatmul.msk.f32.gmra.mxu2 %vm25_vm0, %v2515_v43 }
 0x1e5   :  { %2050 = vmatmul.msk.f32.gmra.mxu2 %vm25_vm0, %v2520_v45 }
 0x1ed   :  { %2051 = vmatmul.msk.f32.gmra.mxu2 %vm25_vm0, %v2525_v47 }
 0x1f5   :  { %2052 = vmatmul.msk.f32.gmra.mxu2 %vm25_vm0, %v2530_v48 }
 0x1fd   :  { %2053 = vmatmul.msk.f32.gmra.mxu2 %vm25_vm0, %v2535_v50 }
 0x205   :  { %2054 = vmatmul.msk.f32.gmra.mxu2 %vm25_vm0, %v2546_v54 }
 0x20d   :  { %2055 = vmatmul.msk.f32.gmra.mxu2 %vm25_vm0, %v2563_v60 }
 0x215   :  { %2056 = vmatmul.msk.f32.gmra.mxu2 %vm25_vm0, %v2574_v0 }
 0x21d   :  { %2057 = vmatmul.msk.f32.gmra.mxu2 %vm25_vm0, %v2585_v3 }
 0x225   :  { %2058 = vmatmul.msk.f32.gmra.mxu2 %vm25_vm0, %v2602_v9 }
 0x22c   :  { %v375_v15 = vpop.f32.mrf.mxu0 }
 0x22d   :  { %v376_v16 = vadd.f32 %v2228_v14, %v375_v15  ;;  %2059 = vmatmul.msk.f32.gmra.mxu2 %vm25_vm0, %v2613_v13 }
 0x22f   :  { %v381_v18 = vmax.f32 %v376_v16, 0.0 }
 0x231   :  { %2043 = vmatmul.msk.f32.vlgmr.msrb.gmra.mxu1 %vm393_vm13, %v381_v18 }
 0x234   :  { %v378_v20 = vpop.f32.mrf.mxu0 }
 0x235   :  { %v379_v21 = vadd.f32 %v2228_v14, %v378_v20  ;;  %2060 = vmatmul.msk.f32.gmra.mxu2 %vm25_vm0, %v2622_v19 }
 0x237   :  { %v382_v22 = vmax.f32 %v379_v21, 0.0 }
 0x239   :  { %2044 = vmatmul.msk.f32.gmra.mxu1 %vm393_vm13, %v382_v22 }
 0x240   :  { %v496_v24 = vpop.f32.mrf.mxu2 }
 0x241   :  { %v497_v25 = vadd.f32 %v2630_v23, %v496_v24 }
 0x243   :  { %v544_v26 = vmax.f32 %v497_v25, 0.0  ;;  %v2230_v25 = vld [vmem:[%s3466_s2 + $0x108] ss:$0 sm:$0xff] }
 0x245   :  { %2061 = vmatmul.msk.f32.vlgmr.msra.gmra.mxu0 %vm393_vm13, %v544_v26 }
 0x248   :  { %v499_v28 = vpop.f32.mrf.mxu2 }
 0x249   :  { %v500_v29 = vadd.f32 %v2630_v23, %v499_v28 }
 0x24b   :  { %v545_v30 = vmax.f32 %v500_v29, 0.0 }
 0x24d   :  { %2062 = vmatmul.msk.f32.gmra.mxu0 %vm393_vm13, %v545_v30 }
 0x250   :  { %v502_v32 = vpop.f32.mrf.mxu2 }
 0x251   :  { %v503_v33 = vadd.f32 %v2630_v23, %v502_v32 }
 0x253   :  { %v546_v34 = vmax.f32 %v503_v33, 0.0 }
 0x255   :  { %2063 = vmatmul.msk.f32.gmra.mxu0 %vm393_vm13, %v546_v34 }
 0x258   :  { %v505_v36 = vpop.f32.mrf.mxu2 }
 0x259   :  { %v506_v37 = vadd.f32 %v2630_v23, %v505_v36 }
 0x25b   :  { %v547_v40 = vmax.f32 %v506_v37, 0.0 }
 0x25d   :  { %2064 = vmatmul.msk.f32.gmra.mxu0 %vm393_vm13, %v547_v40 }
 0x260   :  { %v508_v42 = vpop.f32.mrf.mxu2 }
 0x261   :  { %v509_v44 = vadd.f32 %v2630_v23, %v508_v42 }
 0x263   :  { %v548_v46 = vmax.f32 %v509_v44, 0.0 }
 0x265   :  { %2065 = vmatmul.msk.f32.gmra.mxu0 %vm393_vm13, %v548_v46  ;;  %v742_v46 = vld [vmem:[%s3466_s2 + $0x1d8] sm:$0xff] }
 0x268   :  { %v511_v49 = vpop.f32.mrf.mxu2 }
 0x269   :  { %v512_v51 = vadd.f32 %v2630_v23, %v511_v49  ;;  %v739_v49 = vld [vmem:[%s3466_s2 + $0x1c0] sm:$0xff] }
 0x26b   :  { %v549_v52 = vmax.f32 %v512_v51, 0.0  ;;  %v738_v51 = vld [vmem:[%s3466_s2 + $0x1b8] sm:$0xff] }
 0x26d   :  { %2066 = vmatmul.msk.f32.gmra.mxu0 %vm393_vm13, %v549_v52  ;;  %v737_v52 = vld [vmem:[%s3466_s2 + $0x1b0] sm:$0xff] }
 0x270   :  { %v514_v53 = vpop.f32.mrf.mxu2 }
 0x271   :  { %v515_v55 = vadd.f32 %v2630_v23, %v514_v53  ;;  %v736_v53 = vld [vmem:[%s3466_s2 + $0x1a8] sm:$0xff] }
 0x273   :  { %v550_v56 = vmax.f32 %v515_v55, 0.0  ;;  %v780_v55 = vld [vmem:[%s3466_s2 + $0x208] sm:$0xff] }
 0x275   :  { %2067 = vmatmul.msk.f32.gmra.mxu0 %vm393_vm13, %v550_v56  ;;  %v779_v56 = vld [vmem:[%s3466_s2 + $0x200] sm:$0xff] }
 0x278   :  { %v517_v57 = vpop.f32.mrf.mxu2 }
 0x279   :  { %v518_v58 = vadd.f32 %v2630_v23, %v517_v57  ;;  %v778_v57 = vld [vmem:[%s3466_s2 + $0x1f8] sm:$0xff] }
 0x27b   :  { %v551_v59 = vmax.f32 %v518_v58, 0.0  ;;  %v777_v58 = vld [vmem:[%s3466_s2 + $0x1f0] sm:$0xff] }
 0x27d   :  { %2068 = vmatmul.msk.f32.gmra.mxu0 %vm393_vm13, %v551_v59 }
 0x280   :  { %v520_v61 = vpop.f32.mrf.mxu2 }
 0x281   :  { %v521_v62 = vadd.f32 %v2630_v23, %v520_v61  ;;  %v2232_v61 = vld [vmem:[%s3466_s2 + $0x1a0] ss:$0 sm:$0xff] }
 0x283   :  { %v552_v63 = vmax.f32 %v521_v62, 0.0 }
 0x285   :  { %2069 = vmatmul.msk.f32.gmra.mxu0 %vm393_vm13, %v552_v63 }
 0x288   :  { %v523_v4 = vpop.f32.mrf.mxu2 }
 0x289   :  { %v524_v5 = vadd.f32 %v2630_v23, %v523_v4 }
 0x28b   :  { %v553_v6 = vmax.f32 %v524_v5, 0.0 }
 0x28d   :  { %2070 = vmatmul.msk.f32.vlgmr.msrb.gmra.mxu2 %vm393_vm13, %v553_v6  ;;  %v2732_v6 = vld [vmem:[%s3466_s2 + $0x178] ss:$0 sm:$0xff] }
 0x290   :  { %v526_v8 = vpop.f32.mrf.mxu2 }
 0x291   :  { %v527_v10 = vadd.f32 %v2630_v23, %v526_v8  ;;  %v919_v8 = vld [vmem:[%s3466_s2 + $0x250] sm:$0xff] }
 0x292   :  { %978 = vmatpush.msra.mxu3 %v919_v8  ;;  %v2862_v8 = vpop.permute.xlu1 %1053 }
 0x293   :  { %v554_v12 = vmax.f32 %v527_v10, 0.0 }
 0x295   :  { %2071 = vmatmul.msk.f32.gmra.mxu2 %vm393_vm13, %v554_v12 }
 0x298   :  { %v529_v14 = vpop.f32.mrf.mxu2 }
 0x299   :  { %v530_v15 = vadd.f32 %v2630_v23, %v529_v14 }
 0x29b   :  { %v555_v16 = vmax.f32 %v530_v15, 0.0 }
 0x29d   :  { %2072 = vmatmul.msk.f32.gmra.mxu2 %vm393_vm13, %v555_v16 }
 0x2a0   :  { %v532_v17 = vpop.f32.mrf.mxu2 }
 0x2a1   :  { %v533_v18 = vadd.f32 %v2630_v23, %v532_v17  ;;  %v918_v17 = vld [vmem:[%s3466_s2 + $0x248] sm:$0xff] }
 0x2a2   :  { %979 = vmatpush.msra.mxu3 %v918_v17 }
 0x2a3   :  { %v556_v20 = vmax.f32 %v533_v18, 0.0 }
 0x2a5   :  { %2073 = vmatmul.msk.f32.gmra.mxu2 %vm393_vm13, %v556_v20 }
 0x2a8   :  { %v535_v21 = vpop.f32.mrf.mxu2 }
 0x2a9   :  { %v536_v22 = vadd.f32 %v2630_v23, %v535_v21 }
 0x2ab   :  { %v557_v24 = vmax.f32 %v536_v22, 0.0  ;;  %v917_v22 = vld [vmem:[%s3466_s2 + $0x240] sm:$0xff] }
 0x2ac   :  { %980 = vmatpush.msra.mxu3 %v917_v22 }
 0x2ad   :  { %2074 = vmatmul.msk.f32.gmra.mxu2 %vm393_vm13, %v557_v24 }
 0x2ae   :  { %v417_v26 = vpop.f32.mrf.mxu1 }
 0x2af   :  { %v418_v28 = vadd.f32 %v2230_v25, %v417_v26 }
 0x2b0   :  { %v538_v29 = vpop.f32.mrf.mxu2 }
 0x2b1   :  { %v2676_v30 = vadd.f32 %v418_v28, %v2480_v27  ;;  %v539_v32 = vadd.f32 %v2630_v23, %v538_v29  ;;  %v743_v27 = vld [vmem:[%s3466_s2 + $0x1e0] sm:$0xff] }
 0x2b2   :  { %760 = vmatpush.msrb.mxu1 %v743_v27 }
 0x2b3   :  { %v558_v33 = vmax.f32 %v539_v32, 0.0  ;;  %2077 = vmatmul.msk.f32.vlgmr.msra.gmra.mxu1 %vm25_vm0, %v2676_v30  ;;  %v916_v32 = vld [vmem:[%s3466_s2 + $0x238] sm:$0xff] }
 0x2b4   :  { %761 = vmatpush.msrb.mxu1 %v742_v46  ;;  %981 = vmatpush.msra.mxu3 %v916_v32  ;;  %v1101_v32 = vld [vmem:[%s3466_s2 + $0x2a0] sm:$0xff] }
 0x2b5   :  { %2075 = vmatmul.msk.f32.gmra.mxu2 %vm393_vm13, %v558_v33  ;;  %1122 = vmatpush.msrb.mxu0 %v1101_v32 }
 0x2b6   :  { %v420_v34 = vpop.f32.mrf.mxu1 }
 0x2b7   :  { %v421_v36 = vadd.f32 %v2230_v25, %v420_v34 }
 0x2b8   :  { %v541_v37 = vpop.f32.mrf.mxu2 }
 0x2b9   :  { %v2683_v40 = vadd.f32 %v421_v36, %v2484_v31  ;;  %v542_v42 = vadd.f32 %v2630_v23, %v541_v37  ;;  %v741_v31 = vld [vmem:[%s3466_s2 + $0x1d0] sm:$0xff]  ;;  %v740_v23 = vld [vmem:[%s3466_s2 + $0x1c8] sm:$0xff] }
 0x2ba   :  { %762 = vmatpush.msrb.mxu1 %v741_v31 }
 0x2bb   :  { %v559_v44 = vmax.f32 %v542_v42, 0.0  ;;  %2078 = vmatmul.msk.f32.gmra.mxu1 %vm25_vm0, %v2683_v40 }
 0x2bc   :  { %763 = vmatpush.msrb.mxu1 %v740_v23 }
 0x2bd   :  { %2076 = vmatmul.msk.f32.gmra.mxu2 %vm393_vm13, %v559_v44 }
 0x2be   :  { %764 = vmatpush.msrb.mxu1 %v739_v49  ;;  %v1061_v49 = vld [vmem:[%s3466_s2 + $0x260] sm:$0xff] }
 0x2c0   :  { %765 = vmatpush.msrb.mxu1 %v738_v51 }
 0x2c2   :  { %766 = vmatpush.msrb.mxu1 %v737_v52  ;;  %v635_v59 = vpop.f32.mrf.mxu0 }
 0x2c3   :  { %v636_v10 = vadd.f32 %v2732_v6, %v635_v59 }
 0x2c4   :  { %767 = vmatpush.msrb.mxu1 %v736_v53 }
 0x2c5   :  { %v2740_v12 = vadd.f32 %v636_v10, %v2495_v35 }
 0x2c6   :  { %843 = vmatpush.msra.mxu1 %v780_v55 }
 0x2c8   :  { %844 = vmatpush.msra.mxu1 %v779_v56 }
 0x2ca   :  { %845 = vmatpush.msra.mxu1 %v778_v57  ;;  %v638_v2 = vpop.f32.mrf.mxu0 }
 0x2cb   :  { %v639_v14 = vadd.f32 %v2732_v6, %v638_v2  ;;  %v2233_v2 = vld [vmem:[%s3466_s2 + $0x1e8] ss:$0 sm:$0xff] }
 0x2cc   :  { %846 = vmatpush.msra.mxu1 %v777_v58 }
 0x2cd   :  { %v2746_v16 = vadd.f32 %v639_v14, %v2500_v38 }
 0x2d2   :  { %v641_v11 = vpop.f32.mrf.mxu0 }
 0x2d3   :  { %v642_v35 = vadd.f32 %v2732_v6, %v641_v11 }
 0x2d5   :  { %v2755_v18 = vadd.f32 %v642_v35, %v2505_v39  ;;  %v1064_v39 = vld [vmem:[%s3466_s2 + $0x278] sm:$0xff] }
 0x2d6   :  { %1085 = vmatpush.msra.mxu2 %v1064_v39 }
 0x2da   :  { %v644_v15 = vpop.f32.mrf.mxu0 }
 0x2db   :  { %v645_v38 = vadd.f32 %v2732_v6, %v644_v15 }
 0x2dd   :  { %v2761_v21 = vadd.f32 %v645_v38, %v2510_v41 }
 0x2e2   :  { %v647_v20 = vpop.f32.mrf.mxu0 }
 0x2e3   :  { %v648_v25 = vadd.f32 %v2732_v6, %v647_v20  ;;  %v2888_v20 = vld [vmem:[%s3466_s2 + $0x210] ss:$0 sm:$0xff] }
 0x2e5   :  { %v2773_v26 = vadd.f32 %v648_v25, %v2515_v43  ;;  %v1063_v43 = vld [vmem:[%s3466_s2 + $0x270] sm:$0xff] }
 0x2e6   :  { %1086 = vmatpush.msra.mxu2 %v1063_v43 }
 0x2ea   :  { %v650_v24 = vpop.f32.mrf.mxu0 }
 0x2eb   :  { %v651_v41 = vadd.f32 %v2732_v6, %v650_v24 }
 0x2ed   :  { %v2779_v29 = vadd.f32 %v651_v41, %v2520_v45  ;;  %v915_v45 = vld [vmem:[%s3466_s2 + $0x230] sm:$0xff] }
 0x2ee   :  { %982 = vmatpush.msra.mxu3 %v915_v45 }
 0x2f2   :  { %v653_v28 = vpop.f32.mrf.mxu0 }
 0x2f3   :  { %v654_v33 = vadd.f32 %v2732_v6, %v653_v28 }
 0x2f5   :  { %v2791_v36 = vadd.f32 %v654_v33, %v2525_v47  ;;  %v1062_v47 = vld [vmem:[%s3466_s2 + $0x268] sm:$0xff] }
 0x2f6   :  { %1087 = vmatpush.msra.mxu2 %v1062_v47 }
 0x2f8   :  { %1088 = vmatpush.msra.mxu2 %v1061_v49 }
 0x2fa   :  { %v656_v34 = vpop.f32.mrf.mxu0 }
 0x2fb   :  { %v657_v37 = vadd.f32 %v2732_v6, %v656_v34 }
 0x2fd   :  { %v2800_v44 = vadd.f32 %v657_v37, %v2530_v48  ;;  %v914_v48 = vld [vmem:[%s3466_s2 + $0x228] sm:$0xff] }
 0x2fe   :  { %983 = vmatpush.msra.mxu3 %v914_v48 }
 0x302   :  { %v659_v27 = vpop.f32.mrf.mxu0 }
 0x303   :  { %v660_v46 = vadd.f32 %v2732_v6, %v659_v27 }
 0x305   :  { %v2809_v23 = vadd.f32 %v660_v46, %v2535_v50 }
 0x310   :  { %v662_v42 = vpop.f32.mrf.mxu2 }
 0x311   :  { %v663_v51 = vadd.f32 %v2732_v6, %v662_v42 }
 0x313   :  { %v2821_v52 = vadd.f32 %v663_v51, %v2546_v54  ;;  %v913_v54 = vld [vmem:[%s3466_s2 + $0x220] sm:$0xff] }
 0x314   :  { %984 = vmatpush.msra.mxu3 %v913_v54 }
 0x318   :  { %v665_v31 = vpop.f32.mrf.mxu2 }
 0x319   :  { %v666_v53 = vadd.f32 %v2732_v6, %v665_v31  ;;  %v1100_v31 = vld [vmem:[%s3466_s2 + $0x298] sm:$0xff] }
 0x31a   :  { %1123 = vmatpush.msrb.mxu0 %v1100_v31 }
 0x31b   :  { %v2827_v55 = vadd.f32 %v666_v53, %v2563_v60 }
 0x320   :  { %v668_v50 = vpop.f32.mrf.mxu2 }
 0x321   :  { %v669_v57 = vadd.f32 %v2732_v6, %v668_v50 }
 0x323   :  { %v2836_v58 = vadd.f32 %v669_v57, %v2574_v0  ;;  %v1099_v57 = vld [vmem:[%s3466_s2 + $0x290] sm:$0xff] }
 0x324   :  { %1124 = vmatpush.msrb.mxu0 %v1099_v57 }
 0x328   :  { %v671_v56 = vpop.f32.mrf.mxu2 }
 0x329   :  { %v672_v60 = vadd.f32 %v2732_v6, %v671_v56 }
 0x330   :  { %v728_v62 = vpop.f32.mrf.mxu1  ;;  %v674_v59 = vpop.f32.mrf.mxu2 }
 0x331   :  { %v729_v63 = vadd.f32 %v2232_v61, %v728_v62  ;;  %v912_v62 = vld [vmem:[%s3466_s2 + $0x218] sm:$0xff]  ;;  %v675_v0 = vadd.f32 %v2732_v6, %v674_v59 }
 0x332   :  { %985 = vmatpush.msra.mxu3 %v912_v62 }
 0x333   :  { %v734_v1 = vmax.f32 %v729_v63, 0.0 }
 0x335   :  { %2079 = vmatmul.msk.f32.vlgmr.msrb.gmra.mxu1 %vm393_vm13, %v734_v1  ;;  %v2851_v1 = vadd.f32 %v675_v0, %v2602_v9 }
 0x338   :  { %v731_v4 = vpop.f32.mrf.mxu1  ;;  %v677_v63 = vpop.f32.mrf.mxu2 }
 0x339   :  { %v732_v5 = vadd.f32 %v2232_v61, %v731_v4  ;;  %v2842_v61 = vadd.f32 %v672_v60, %v2585_v3  ;;  %v678_v3 = vadd.f32 %v2732_v6, %v677_v63 }
 0x33b   :  { %v735_v7 = vmax.f32 %v732_v5, 0.0  ;;  %v2860_v5 = vadd.f32 %v678_v3, %v2613_v13  ;;  %v1098_v3 = vld [vmem:[%s3466_s2 + $0x288] sm:$0xff] }
 0x33c   :  { %1125 = vmatpush.msrb.mxu0 %v1098_v3 }
 0x33d   :  { %2080 = vmatmul.msk.f32.gmra.mxu1 %vm393_vm13, %v735_v7 }
 0x340   :  { %v680_v10 = vpop.f32.mrf.mxu2 }
 0x341   :  { %v681_v11 = vadd.f32 %v2732_v6, %v680_v10 }
 0x343   :  { %v2874_v13 = vadd.f32 %v681_v11, %v2622_v19 }
 0x345   :  { %2081 = vmatmul.msk.f32.vlgmr.msra.gmra.mxu1 %vm25_vm0, %v2740_v12 }
 0x34d   :  { %2082 = vmatmul.msk.f32.gmra.mxu1 %vm25_vm0, %v2746_v16 }
 0x355   :  { %2083 = vmatmul.msk.f32.gmra.mxu1 %vm25_vm0, %v2755_v18 }
 0x35d   :  { %2084 = vmatmul.msk.f32.gmra.mxu1 %vm25_vm0, %v2761_v21 }
 0x365   :  { %2085 = vmatmul.msk.f32.gmra.mxu1 %vm25_vm0, %v2773_v26 }
 0x36d   :  { %2086 = vmatmul.msk.f32.gmra.mxu1 %vm25_vm0, %v2779_v29 }
 0x375   :  { %2087 = vmatmul.msk.f32.gmra.mxu1 %vm25_vm0, %v2791_v36 }
 0x37d   :  { %2088 = vmatmul.msk.f32.gmra.mxu1 %vm25_vm0, %v2800_v44 }
 0x385   :  { %2089 = vmatmul.msk.f32.gmra.mxu1 %vm25_vm0, %v2809_v23 }
 0x38d   :  { %2090 = vmatmul.msk.f32.gmra.mxu1 %vm25_vm0, %v2821_v52 }
 0x395   :  { %2091 = vmatmul.msk.f32.gmra.mxu1 %vm25_vm0, %v2827_v55 }
 0x39d   :  { %2092 = vmatmul.msk.f32.gmra.mxu1 %vm25_vm0, %v2836_v58 }
 0x3a5   :  { %2093 = vmatmul.msk.f32.gmra.mxu1 %vm25_vm0, %v2842_v61 }
 0x3ad   :  { %2094 = vmatmul.msk.f32.gmra.mxu1 %vm25_vm0, %v2851_v1 }
 0x3b2   :  { %v769_v4 = vpop.f32.mrf.mxu1 }
 0x3b3   :  { %v770_v7 = vadd.f32 %v2233_v2, %v769_v4 }
 0x3b5   :  { %v2865_v9 = vadd.f32 %v770_v7, %v2676_v30  ;;  %2095 = vmatmul.msk.f32.gmra.mxu1 %vm25_vm0, %v2860_v5  ;;  %v2881_v30 = vpop.permute.xlu1 %1055 }
 0x3b7   :  { %v1059_v14 = vadd.f32 %v2862_v8, %v2865_v9 }
 0x3b9   :  { %2113 = vmatmul.msk.f32.vlgmr.msra.gmra.mxu2 %vm25_vm0, %v1059_v14 }
 0x3ba   :  { %v772_v15 = vpop.f32.mrf.mxu1 }
 0x3bb   :  { %v773_v17 = vadd.f32 %v2233_v2, %v772_v15  ;;  %v1408_v15 = vld [vmem:[%s3466_s2 + $0x318] sm:$0xff] }
 0x3bc   :  { %1429 = vmatpush.msrb.mxu1 %v1408_v15 }
 0x3bd   :  { %v2877_v35 = vadd.f32 %v773_v17, %v2683_v40  ;;  %2096 = vmatmul.msk.f32.gmra.mxu1 %vm25_vm0, %v2874_v13 }
 0x3bf   :  { %v1060_v6 = vadd.f32 %v2881_v30, %v2877_v35 }
 0x3c1   :  { %2114 = vmatmul.msk.f32.gmra.mxu2 %vm25_vm0, %v1060_v6 }
 0x3c2   :  { %v848_v19 = vpop.f32.mrf.mxu1 }
 0x3c3   :  { %v849_v38 = vadd.f32 %v2888_v20, %v848_v19 }
 0x3c5   :  { %v896_v40 = vmax.f32 %v849_v38, 0.0  ;;  %v1138_v38 = vld [vmem:[%s3466_s2 + $0x2c8] sm:$0xff] }
 0x3c6   :  { %1201 = vmatpush.msrb.mxu2 %v1138_v38 }
 0x3c7   :  { %2097 = vmatmul.msk.f32.vlgmr.msra.gmra.mxu3 %vm393_vm13, %v896_v40  ;;  %v1137_v40 = vld [vmem:[%s3466_s2 + $0x2c0] sm:$0xff] }
 0x3c8   :  { %1202 = vmatpush.msrb.mxu2 %v1137_v40 }
 0x3ca   :  { %v851_v22 = vpop.f32.mrf.mxu1 }
 0x3cb   :  { %v852_v39 = vadd.f32 %v2888_v20, %v851_v22 }
 0x3cd   :  { %v897_v24 = vmax.f32 %v852_v39, 0.0 }
 0x3cf   :  { %2098 = vmatmul.msk.f32.gmra.mxu3 %vm393_vm13, %v897_v24  ;;  %v1136_v24 = vld [vmem:[%s3466_s2 + $0x2b8] sm:$0xff] }
 0x3d0   :  { %1203 = vmatpush.msrb.mxu2 %v1136_v24 }
 0x3d2   :  { %v854_v25 = vpop.f32.mrf.mxu1 }
 0x3d3   :  { %v855_v41 = vadd.f32 %v2888_v20, %v854_v25 }
 0x3d5   :  { %v898_v28 = vmax.f32 %v855_v41, 0.0  ;;  %v1135_v41 = vld [vmem:[%s3466_s2 + $0x2b0] sm:$0xff] }
 0x3d6   :  { %1204 = vmatpush.msrb.mxu2 %v1135_v41 }
 0x3d7   :  { %2099 = vmatmul.msk.f32.gmra.mxu3 %vm393_vm13, %v898_v28 }
 0x3da   :  { %v857_v43 = vpop.f32.mrf.mxu1 }
 0x3db   :  { %v858_v33 = vadd.f32 %v2888_v20, %v857_v43 }
 0x3dd   :  { %v899_v34 = vmax.f32 %v858_v33, 0.0  ;;  %v2235_v33 = vld [vmem:[%s3466_s2 + $0x280] ss:$0 sm:$0xff] }
 0x3df   :  { %2100 = vmatmul.msk.f32.gmra.mxu3 %vm393_vm13, %v899_v34 }
 0x3e2   :  { %v860_v45 = vpop.f32.mrf.mxu1 }
 0x3e3   :  { %v861_v37 = vadd.f32 %v2888_v20, %v860_v45 }
 0x3e5   :  { %v900_v42 = vmax.f32 %v861_v37, 0.0 }
 0x3e7   :  { %2101 = vmatmul.msk.f32.gmra.mxu3 %vm393_vm13, %v900_v42 }
 0x3ea   :  { %v863_v27 = vpop.f32.mrf.mxu1 }
 0x3eb   :  { %v864_v47 = vadd.f32 %v2888_v20, %v863_v27 }
 0x3ed   :  { %v901_v46 = vmax.f32 %v864_v47, 0.0 }
 0x3ef   :  { %2102 = vmatmul.msk.f32.gmra.mxu3 %vm393_vm13, %v901_v46 }
 0x3f2   :  { %v866_v48 = vpop.f32.mrf.mxu1 }
 0x3f3   :  { %v867_v49 = vadd.f32 %v2888_v20, %v866_v48  ;;  %v1407_v48 = vld [vmem:[%s3466_s2 + $0x310] sm:$0xff] }
 0x3f4   :  { %1430 = vmatpush.msrb.mxu1 %v1407_v48  ;;  %v2237_v48 = vld [vmem:[%s3466_s2 + $0x2a8] ss:$0 sm:$0xff] }
 0x3f5   :  { %v902_v51 = vmax.f32 %v867_v49, 0.0 }
 0x3f7   :  { %2103 = vmatmul.msk.f32.gmra.mxu3 %vm393_vm13, %v902_v51 }
 0x3fa   :  { %v869_v50 = vpop.f32.mrf.mxu1 }
 0x3fb   :  { %v870_v53 = vadd.f32 %v2888_v20, %v869_v50 }
 0x3fd   :  { %v903_v56 = vmax.f32 %v870_v53, 0.0 }
 0x3ff   :  { %2104 = vmatmul.msk.f32.gmra.mxu3 %vm393_vm13, %v903_v56 }
 0x402   :  { %v872_v54 = vpop.f32.mrf.mxu1 }
 0x403   :  { %v873_v60 = vadd.f32 %v2888_v20, %v872_v54 }
 0x405   :  { %v904_v59 = vmax.f32 %v873_v60, 0.0 }
 0x407   :  { %2105 = vmatmul.msk.f32.gmra.mxu3 %vm393_vm13, %v904_v59 }
 0x40a   :  { %v875_v62 = vpop.f32.mrf.mxu1 }
 0x40b   :  { %v876_v0 = vadd.f32 %v2888_v20, %v875_v62 }
 0x40d   :  { %v905_v63 = vmax.f32 %v876_v0, 0.0 }
 0x40f   :  { %2106 = vmatmul.msk.f32.gmra.mxu3 %vm393_vm13, %v905_v63 }
 0x412   :  { %v878_v2 = vpop.f32.mrf.mxu1 }
 0x413   :  { %v879_v4 = vadd.f32 %v2888_v20, %v878_v2 }
 0x415   :  { %v906_v7 = vmax.f32 %v879_v4, 0.0 }
 0x417   :  { %2107 = vmatmul.msk.f32.gmra.mxu3 %vm393_vm13, %v906_v7 }
 0x41a   :  { %v881_v10 = vpop.f32.mrf.mxu1 }
 0x41b   :  { %v882_v11 = vadd.f32 %v2888_v20, %v881_v10 }
 0x41d   :  { %v907_v14 = vmax.f32 %v882_v11, 0.0 }
 0x41f   :  { %2108 = vmatmul.msk.f32.gmra.mxu3 %vm393_vm13, %v907_v14 }
 0x422   :  { %v884_v17 = vpop.f32.mrf.mxu1 }
 0x423   :  { %v885_v6 = vadd.f32 %v2888_v20, %v884_v17 }
 0x425   :  { %v908_v19 = vmax.f32 %v885_v6, 0.0 }
 0x427   :  { %2109 = vmatmul.msk.f32.gmra.mxu3 %vm393_vm13, %v908_v19 }
 0x42a   :  { %v887_v22 = vpop.f32.mrf.mxu1 }
 0x42b   :  { %v888_v39 = vadd.f32 %v2888_v20, %v887_v22 }
 0x42d   :  { %v909_v25 = vmax.f32 %v888_v39, 0.0 }
 0x42f   :  { %2110 = vmatmul.msk.f32.gmra.mxu3 %vm393_vm13, %v909_v25 }
 0x432   :  { %v890_v28 = vpop.f32.mrf.mxu1 }
 0x433   :  { %v891_v32 = vadd.f32 %v2888_v20, %v890_v28 }
 0x435   :  { %v910_v43 = vmax.f32 %v891_v32, 0.0 }
 0x437   :  { %2111 = vmatmul.msk.f32.gmra.mxu3 %vm393_vm13, %v910_v43  ;;  %v1452_v43 = vld [vmem:[%s3466_s2 + $0x328] sm:$0xff] }
 0x43a   :  { %v893_v34 = vpop.f32.mrf.mxu1 }
 0x43b   :  { %v894_v45 = vadd.f32 %v2888_v20, %v893_v34  ;;  %v2960_v20 = vld [vmem:[%s3466_s2 + $0x258] ss:$0 sm:$0xff] }
 0x43c   :  { %v1090_v37 = vpop.f32.mrf.mxu2 }
 0x43d   :  { %v911_v42 = vmax.f32 %v894_v45, 0.0  ;;  %v1091_v27 = vadd.f32 %v2235_v33, %v1090_v37  ;;  %v1272_v45 = vld [vmem:[%s3466_s2 + $0x2e8] sm:$0xff] }
 0x43f   :  { %v1096_v47 = vmax.f32 %v1091_v27, 0.0  ;;  %2112 = vmatmul.msk.f32.gmra.mxu3 %vm393_vm13, %v911_v42  ;;  %v1271_v27 = vld [vmem:[%s3466_s2 + $0x2e0] sm:$0xff] }
 0x441   :  { %2115 = vmatmul.msk.f32.vlgmr.msrb.gmra.mxu0 %vm25_vm0, %v1096_v47  ;;  %v1270_v47 = vld [vmem:[%s3466_s2 + $0x2d8] sm:$0xff] }
 0x444   :  { %v1093_v46 = vpop.f32.mrf.mxu2 }
 0x445   :  { %v1094_v31 = vadd.f32 %v2235_v33, %v1093_v46  ;;  %v1273_v33 = vld [vmem:[%s3466_s2 + $0x2f0] sm:$0xff] }
 0x446   :  { %1336 = vmatpush.msra.mxu0 %v1273_v33 }
 0x447   :  { %v1097_v49 = vmax.f32 %v1094_v31, 0.0 }
 0x448   :  { %1337 = vmatpush.msra.mxu0 %v1272_v45 }
 0x449   :  { %2116 = vmatmul.msk.f32.gmra.mxu0 %vm25_vm0, %v1097_v49 }
 0x44a   :  { %v987_v51 = vpop.f32.mrf.mxu3  ;;  %1338 = vmatpush.msra.mxu0 %v1271_v27 }
 0x44b   :  { %v988_v50 = vadd.f32 %v2960_v20, %v987_v51 }
 0x44c   :  { %1339 = vmatpush.msra.mxu0 %v1270_v47  ;;  %v1492_v47 = vld [vmem:[%s3466_s2 + $0x368] sm:$0xff] }
 0x44d   :  { %v2965_v53 = vadd.f32 %v988_v50, %v2740_v12 }
 0x44f   :  { %2117 = vmatmul.msk.f32.vlgmr.msrb.gmra.mxu2 %vm25_vm0, %v2965_v53 }
 0x452   :  { %v990_v56 = vpop.f32.mrf.mxu3 }
 0x453   :  { %v991_v57 = vadd.f32 %v2960_v20, %v990_v56 }
 0x455   :  { %v2971_v54 = vadd.f32 %v991_v57, %v2746_v16  ;;  %v1406_v16 = vld [vmem:[%s3466_s2 + $0x308] sm:$0xff] }
 0x456   :  { %1431 = vmatpush.msrb.mxu1 %v1406_v16 }
 0x457   :  { %2118 = vmatmul.msk.f32.gmra.mxu2 %vm25_vm0, %v2971_v54 }
 0x45a   :  { %v993_v60 = vpop.f32.mrf.mxu3 }
 0x45b   :  { %v994_v59 = vadd.f32 %v2960_v20, %v993_v60 }
 0x45d   :  { %v2977_v62 = vadd.f32 %v994_v59, %v2755_v18 }
 0x45f   :  { %2119 = vmatmul.msk.f32.gmra.mxu2 %vm25_vm0, %v2977_v62 }
 0x462   :  { %v996_v12 = vpop.f32.mrf.mxu3 }
 0x463   :  { %v997_v0 = vadd.f32 %v2960_v20, %v996_v12 }
 0x465   :  { %v2983_v63 = vadd.f32 %v997_v0, %v2761_v21 }
 0x467   :  { %2120 = vmatmul.msk.f32.gmra.mxu2 %vm25_vm0, %v2983_v63 }
 0x46a   :  { %v999_v3 = vpop.f32.mrf.mxu3 }
 0x46b   :  { %v1000_v18 = vadd.f32 %v2960_v20, %v999_v3 }
 0x46d   :  { %v2992_v2 = vadd.f32 %v1000_v18, %v2773_v26 }
 0x46f   :  { %2121 = vmatmul.msk.f32.gmra.mxu2 %vm25_vm0, %v2992_v2 }
 0x472   :  { %v1002_v4 = vpop.f32.mrf.mxu3 }
 0x473   :  { %v1003_v21 = vadd.f32 %v2960_v20, %v1002_v4 }
 0x475   :  { %v2998_v7 = vadd.f32 %v1003_v21, %v2779_v29  ;;  %v1405_v29 = vld [vmem:[%s3466_s2 + $0x300] sm:$0xff] }
 0x476   :  { %1432 = vmatpush.msrb.mxu1 %v1405_v29 }
 0x477   :  { %2122 = vmatmul.msk.f32.gmra.mxu2 %vm25_vm0, %v2998_v7 }
 0x47a   :  { %v1005_v10 = vpop.f32.mrf.mxu3 }
 0x47b   :  { %v1006_v11 = vadd.f32 %v2960_v20, %v1005_v10 }
 0x47d   :  { %v3004_v14 = vadd.f32 %v1006_v11, %v2791_v36 }
 0x47f   :  { %2123 = vmatmul.msk.f32.gmra.mxu2 %vm25_vm0, %v3004_v14 }
 0x482   :  { %v1008_v26 = vpop.f32.mrf.mxu3 }
 0x483   :  { %v1009_v15 = vadd.f32 %v2960_v20, %v1008_v26 }
 0x485   :  { %v3010_v17 = vadd.f32 %v1009_v15, %v2800_v44 }
 0x487   :  { %2124 = vmatmul.msk.f32.gmra.mxu2 %vm25_vm0, %v3010_v17 }
 0x48a   :  { %v1011_v6 = vpop.f32.mrf.mxu3 }
 0x48b   :  { %v1012_v36 = vadd.f32 %v2960_v20, %v1011_v6 }
 0x48d   :  { %v3019_v19 = vadd.f32 %v1012_v36, %v2809_v23 }
 0x48f   :  { %2125 = vmatmul.msk.f32.gmra.mxu2 %vm25_vm0, %v3019_v19 }
 0x492   :  { %v1014_v38 = vpop.f32.mrf.mxu3 }
 0x493   :  { %v1015_v44 = vadd.f32 %v2960_v20, %v1014_v38 }
 0x495   :  { %v3025_v40 = vadd.f32 %v1015_v44, %v2821_v52  ;;  %v1455_v52 = vld [vmem:[%s3466_s2 + $0x340] sm:$0xff] }
 0x496   :  { %1476 = vmatpush.msra.mxu1 %v1455_v52 }
 0x497   :  { %2126 = vmatmul.msk.f32.gmra.mxu2 %vm25_vm0, %v3025_v40 }
 0x49a   :  { %v1017_v22 = vpop.f32.mrf.mxu3 }
 0x49b   :  { %v1018_v39 = vadd.f32 %v2960_v20, %v1017_v22 }
 0x49d   :  { %v3031_v24 = vadd.f32 %v1018_v39, %v2827_v55  ;;  %v1454_v55 = vld [vmem:[%s3466_s2 + $0x338] sm:$0xff] }
 0x49e   :  { %1477 = vmatpush.msra.mxu1 %v1454_v55 }
 0x49f   :  { %2127 = vmatmul.msk.f32.gmra.mxu2 %vm25_vm0, %v3031_v24 }
 0x4a2   :  { %v1020_v23 = vpop.f32.mrf.mxu3 }
 0x4a3   :  { %v1021_v25 = vadd.f32 %v2960_v20, %v1020_v23 }
 0x4a5   :  { %v3037_v41 = vadd.f32 %v1021_v25, %v2836_v58  ;;  %v1453_v58 = vld [vmem:[%s3466_s2 + $0x330] sm:$0xff] }
 0x4a6   :  { %1478 = vmatpush.msra.mxu1 %v1453_v58 }
 0x4a7   :  { %2128 = vmatmul.msk.f32.gmra.mxu2 %vm25_vm0, %v3037_v41 }
 0x4a8   :  { %1479 = vmatpush.msra.mxu1 %v1452_v43 }
 0x4aa   :  { %v1023_v28 = vpop.f32.mrf.mxu3 }
 0x4ab   :  { %v1024_v32 = vadd.f32 %v2960_v20, %v1023_v28 }
 0x4ad   :  { %v3058_v34 = vadd.f32 %v1024_v32, %v2842_v61 }
 0x4af   :  { %2129 = vmatmul.msk.f32.gmra.mxu2 %vm25_vm0, %v3058_v34 }
 0x4b2   :  { %v1026_v37 = vpop.f32.mrf.mxu3 }
 0x4b3   :  { %v1027_v42 = vadd.f32 %v2960_v20, %v1026_v37 }
 0x4b5   :  { %v3070_v61 = vadd.f32 %v1027_v42, %v2851_v1 }
 0x4b7   :  { %2130 = vmatmul.msk.f32.gmra.mxu2 %vm25_vm0, %v3070_v61 }
 0x4ba   :  { %v1029_v46 = vpop.f32.mrf.mxu3 }
 0x4bb   :  { %v1030_v31 = vadd.f32 %v2960_v20, %v1029_v46  ;;  %v1491_v46 = vld [vmem:[%s3466_s2 + $0x360] sm:$0xff] }
 0x4bd   :  { %v3082_v49 = vadd.f32 %v1030_v31, %v2860_v5 }
 0x4be   :  { %v1127_v1 = vpop.f32.mrf.mxu0 }
 0x4bf   :  { %v1128_v51 = vadd.f32 %v2237_v48, %v1127_v1  ;;  %2131 = vmatmul.msk.f32.gmra.mxu2 %vm25_vm0, %v3082_v49 }
 0x4c1   :  { %v3087_v50 = vadd.f32 %v1128_v51, %v2865_v9  ;;  %v3105_v9 = vld [vmem:[%s3466_s2 + $0x2d0] ss:$0 sm:$0xff]  ;;  %v1490_v51 = vld [vmem:[%s3466_s2 + $0x358] sm:$0xff] }
 0x4c2   :  { %v1032_v56 = vpop.f32.mrf.mxu3 }
 0x4c3   :  { %v1033_v57 = vadd.f32 %v2960_v20, %v1032_v56  ;;  %2149 = vmatmul.msk.f32.vlgmr.msrb.gmra.mxu1 %vm25_vm0, %v3087_v50 }
 0x4c4   :  { %1513 = vmatpush.msrb.mxu1 %v1492_v47 }
 0x4c5   :  { %v3093_v60 = vadd.f32 %v1033_v57, %v2874_v13  ;;  %v1450_v13 = vadd.f32 %v3087_v50, %v2862_v8 }
 0x4c6   :  { %v1130_v59 = vpop.f32.mrf.mxu0  ;;  %1514 = vmatpush.msrb.mxu1 %v1491_v46  ;;  %v1798_v46 = vld [vmem:[%s3466_s2 + $0x3d8] sm:$0xff] }
 0x4c7   :  { %v1131_v5 = vadd.f32 %v2237_v48, %v1130_v59  ;;  %2132 = vmatmul.msk.f32.gmra.mxu2 %vm25_vm0, %v3093_v60  ;;  %v1489_v59 = vld [vmem:[%s3466_s2 + $0x350] sm:$0xff] }
 0x4c8   :  { %1515 = vmatpush.msrb.mxu1 %v1490_v51 }
 0x4c9   :  { %v3098_v12 = vadd.f32 %v1131_v5, %v2877_v35 }
 0x4ca   :  { %1516 = vmatpush.msrb.mxu1 %v1489_v59 }
 0x4cb   :  { %2150 = vmatmul.msk.f32.gmra.mxu1 %vm25_vm0, %v3098_v12  ;;  %v1451_v35 = vadd.f32 %v3098_v12, %v2881_v30 }
 0x4d2   :  { %v1206_v20 = vpop.f32.mrf.mxu2 }
 0x4d3   :  { %v1207_v0 = vadd.f32 %v3105_v9, %v1206_v20  ;;  %2151 = vmatmul.msk.f32.vlgmr.msra.gmra.mxu1 %vm25_vm0, %v1450_v13  ;;  %v1529_v13 = vld [vmem:[%s3466_s2 + $0x390] sm:$0xff] }
 0x4d4   :  { %1592 = vmatpush.msra.mxu1 %v1529_v13 }
 0x4d5   :  { %v1254_v16 = vmax.f32 %v1207_v0, 0.0 }
 0x4d7   :  { %2133 = vmatmul.msk.f32.vlgmr.msra.gmra.mxu0 %vm25_vm0, %v1254_v16  ;;  %v1528_v16 = vld [vmem:[%s3466_s2 + $0x388] sm:$0xff] }
 0x4d8   :  { %1593 = vmatpush.msra.mxu1 %v1528_v16 }
 0x4da   :  { %v1209_v3 = vpop.f32.mrf.mxu2 }
 0x4db   :  { %v1210_v18 = vadd.f32 %v3105_v9, %v1209_v3  ;;  %2152 = vmatmul.msk.f32.gmra.mxu1 %vm25_vm0, %v1451_v35  ;;  %v2239_v3 = vld [vmem:[%s3466_s2 + $0x320] ss:$0 sm:$0xff] }
 0x4dd   :  { %v1255_v4 = vmax.f32 %v1210_v18, 0.0  ;;  %v1527_v18 = vld [vmem:[%s3466_s2 + $0x380] sm:$0xff] }
 0x4de   :  { %1594 = vmatpush.msra.mxu1 %v1527_v18 }
 0x4df   :  { %2134 = vmatmul.msk.f32.gmra.mxu0 %vm25_vm0, %v1255_v4  ;;  %v1526_v4 = vld [vmem:[%s3466_s2 + $0x378] sm:$0xff] }
 0x4e0   :  { %1595 = vmatpush.msra.mxu1 %v1526_v4 }
 0x4e2   :  { %v1212_v8 = vpop.f32.mrf.mxu2 }
 0x4e3   :  { %v1213_v21 = vadd.f32 %v3105_v9, %v1212_v8 }
 0x4e5   :  { %v1256_v10 = vmax.f32 %v1213_v21, 0.0 }
 0x4e7   :  { %2135 = vmatmul.msk.f32.gmra.mxu0 %vm25_vm0, %v1256_v10 }
 0x4ea   :  { %v1215_v11 = vpop.f32.mrf.mxu2 }
 0x4eb   :  { %v1216_v26 = vadd.f32 %v3105_v9, %v1215_v11 }
 0x4ed   :  { %v1257_v15 = vmax.f32 %v1216_v26, 0.0 }
 0x4ef   :  { %2136 = vmatmul.msk.f32.gmra.mxu0 %vm25_vm0, %v1257_v15  ;;  %v1664_v15 = vld [vmem:[%s3466_s2 + $0x3b8] sm:$0xff] }
 0x4f0   :  { %1727 = vmatpush.msrb.mxu3 %v1664_v15 }
 0x4f2   :  { %v1218_v30 = vpop.f32.mrf.mxu2 }
 0x4f3   :  { %v1219_v29 = vadd.f32 %v3105_v9, %v1218_v30 }
 0x4f5   :  { %v1258_v6 = vmax.f32 %v1219_v29, 0.0 }
 0x4f7   :  { %2137 = vmatmul.msk.f32.gmra.mxu0 %vm25_vm0, %v1258_v6 }
 0x4fa   :  { %v1221_v36 = vpop.f32.mrf.mxu2 }
 0x4fb   :  { %v1222_v38 = vadd.f32 %v3105_v9, %v1221_v36 }
 0x4fd   :  { %v1259_v44 = vmax.f32 %v1222_v38, 0.0 }
 0x4ff   :  { %2138 = vmatmul.msk.f32.gmra.mxu0 %vm25_vm0, %v1259_v44  ;;  %v2240_v44 = vld [vmem:[%s3466_s2 + $0x348] ss:$0 sm:$0xff] }
 0x502   :  { %v1224_v22 = vpop.f32.mrf.mxu2 }
 0x503   :  { %v1225_v39 = vadd.f32 %v3105_v9, %v1224_v22  ;;  %v1799_v22 = vld [vmem:[%s3466_s2 + $0x3e0] sm:$0xff] }
 0x504   :  { %1820 = vmatpush.msra.mxu2 %v1799_v22  ;;  %v2242_v22 = vld [vmem:[%s3466_s2 + $0x370] ss:$0 sm:$0xff] }
 0x505   :  { %v1260_v23 = vmax.f32 %v1225_v39, 0.0 }
 0x506   :  { %1821 = vmatpush.msra.mxu2 %v1798_v46 }
 0x507   :  { %2139 = vmatmul.msk.f32.gmra.mxu0 %vm25_vm0, %v1260_v23 }
 0x50a   :  { %v1227_v25 = vpop.f32.mrf.mxu2 }
 0x50b   :  { %v1228_v52 = vadd.f32 %v3105_v9, %v1227_v25 }
 0x50d   :  { %v1261_v55 = vmax.f32 %v1228_v52, 0.0 }
 0x50f   :  { %2140 = vmatmul.msk.f32.gmra.mxu0 %vm25_vm0, %v1261_v55 }
 0x512   :  { %v1230_v28 = vpop.f32.mrf.mxu2 }
 0x513   :  { %v1231_v32 = vadd.f32 %v3105_v9, %v1230_v28  ;;  %v3187_v28 = vld [vmem:[%s3466_s2 + $0x2f8] ss:$0 sm:$0xff] }
 0x515   :  { %v1262_v58 = vmax.f32 %v1231_v32, 0.0 }
 0x517   :  { %2141 = vmatmul.msk.f32.gmra.mxu0 %vm25_vm0, %v1262_v58 }
 0x51a   :  { %v1233_v43 = vpop.f32.mrf.mxu2 }
 0x51b   :  { %v1234_v33 = vadd.f32 %v3105_v9, %v1233_v43 }
 0x51d   :  { %v1263_v45 = vmax.f32 %v1234_v33, 0.0 }
 0x51f   :  { %2142 = vmatmul.msk.f32.gmra.mxu0 %vm25_vm0, %v1263_v45 }
 0x522   :  { %v1236_v37 = vpop.f32.mrf.mxu2 }
 0x523   :  { %v1237_v42 = vadd.f32 %v3105_v9, %v1236_v37 }
 0x525   :  { %v1264_v27 = vmax.f32 %v1237_v42, 0.0  ;;  %v1663_v42 = vld [vmem:[%s3466_s2 + $0x3b0] sm:$0xff] }
 0x526   :  { %1728 = vmatpush.msrb.mxu3 %v1663_v42  ;;  %v1857_v42 = vld [vmem:[%s3466_s2 + $0x400] sm:$0xff] }
 0x527   :  { %2143 = vmatmul.msk.f32.gmra.mxu0 %vm25_vm0, %v1264_v27 }
 0x52a   :  { %v1239_v31 = vpop.f32.mrf.mxu2 }
 0x52b   :  { %v1240_v48 = vadd.f32 %v3105_v9, %v1239_v31 }
 0x52d   :  { %v1265_v1 = vmax.f32 %v1240_v48, 0.0 }
 0x52f   :  { %2144 = vmatmul.msk.f32.gmra.mxu0 %vm25_vm0, %v1265_v1 }
 0x532   :  { %v1242_v56 = vpop.f32.mrf.mxu2 }
 0x533   :  { %v1243_v57 = vadd.f32 %v3105_v9, %v1242_v56 }
 0x535   :  { %v1266_v5 = vmax.f32 %v1243_v57, 0.0 }
 0x537   :  { %2145 = vmatmul.msk.f32.gmra.mxu0 %vm25_vm0, %v1266_v5 }
 0x53a   :  { %v1245_v20 = vpop.f32.mrf.mxu2 }
 0x53b   :  { %v1246_v0 = vadd.f32 %v3105_v9, %v1245_v20  ;;  %v1797_v20 = vld [vmem:[%s3466_s2 + $0x3d0] sm:$0xff] }
 0x53c   :  { %1822 = vmatpush.msra.mxu2 %v1797_v20  ;;  %v1856_v20 = vld [vmem:[%s3466_s2 + $0x3f8] sm:$0xff] }
 0x53d   :  { %v1267_v35 = vmax.f32 %v1246_v0, 0.0 }
 0x53f   :  { %2146 = vmatmul.msk.f32.gmra.mxu0 %vm25_vm0, %v1267_v35 }
 0x540   :  { %v1434_v8 = vpop.f32.mrf.mxu1 }
 0x541   :  { %v1435_v21 = vadd.f32 %v2239_v3, %v1434_v8 }
 0x542   :  { %v1248_v10 = vpop.f32.mrf.mxu2 }
 0x543   :  { %v1249_v11 = vadd.f32 %v3105_v9, %v1248_v10  ;;  %1442 = vrot.lane.b32.xlu2 %v1435_v21, %s2284_s15 }
 0x545   :  { %v1268_v26 = vmax.f32 %v1249_v11, 0.0  ;;  %v1796_v11 = vld [vmem:[%s3466_s2 + $0x3c8] sm:$0xff] }
 0x546   :  { %1823 = vmatpush.msra.mxu2 %v1796_v11 }
 0x547   :  { %2147 = vmatmul.msk.f32.gmra.mxu0 %vm25_vm0, %v1268_v26 }
 0x548   :  { %v1437_v30 = vpop.f32.mrf.mxu1 }
 0x549   :  { %v1438_v29 = vadd.f32 %v2239_v3, %v1437_v30 }
 0x54a   :  { %v1251_v6 = vpop.f32.mrf.mxu2 }
 0x54b   :  { %v1252_v36 = vadd.f32 %v3105_v9, %v1251_v6  ;;  %1444 = vrot.lane.b32.xlu2 %v1438_v29, %s2284_s15 }
 0x54d   :  { %v1269_v38 = vmax.f32 %v1252_v36, 0.0 }
 0x54f   :  { %2148 = vmatmul.msk.f32.gmra.mxu0 %vm25_vm0, %v1269_v38 }
 0x550   :  { %v1481_v39 = vpop.f32.mrf.mxu1 }
 0x551   :  { %v1482_v23 = vadd.f32 %v2240_v44, %v1481_v39 }
 0x553   :  { %v1487_v25 = vmax.f32 %v1482_v23, 0.0 }
 0x554   :  { %v1341_v52 = vpop.f32.mrf.mxu0 }
 0x555   :  { %2153 = vmatmul.msk.f32.vlgmr.msrb.gmra.mxu1 %vm25_vm0, %v1487_v25  ;;  %v1342_v43 = vadd.f32 %v3187_v28, %v1341_v52 }
 0x557   :  { %v3192_v33 = vadd.f32 %v1342_v43, %v2965_v53 }
 0x558   :  { %v1484_v9 = vpop.f32.mrf.mxu1 }
 0x559   :  { %v1485_v55 = vadd.f32 %v2240_v44, %v1484_v9 }
 0x55b   :  { %v1488_v32 = vmax.f32 %v1485_v55, 0.0 }
 0x55c   :  { %v1344_v58 = vpop.f32.mrf.mxu0 }
 0x55d   :  { %2154 = vmatmul.msk.f32.gmra.mxu1 %vm25_vm0, %v1488_v32  ;;  %v1345_v37 = vadd.f32 %v3187_v28, %v1344_v58 }
 0x55f   :  { %v3201_v27 = vadd.f32 %v1345_v37, %v2971_v54 }
 0x564   :  { %v1347_v45 = vpop.f32.mrf.mxu0 }
 0x565   :  { %2155 = vmatmul.msk.f32.vlgmr.msra.gmra.mxu1 %vm25_vm0, %v3192_v33  ;;  %v1348_v53 = vadd.f32 %v3187_v28, %v1347_v45 }
 0x567   :  { %v3210_v31 = vadd.f32 %v1348_v53, %v2977_v62 }
 0x56c   :  { %v1350_v47 = vpop.f32.mrf.mxu0 }
 0x56d   :  { %2156 = vmatmul.msk.f32.gmra.mxu1 %vm25_vm0, %v3201_v27  ;;  %v1351_v54 = vadd.f32 %v3187_v28, %v1350_v47 }
 0x56f   :  { %v3216_v1 = vadd.f32 %v1351_v54, %v2983_v63  ;;  %v1662_v63 = vld [vmem:[%s3466_s2 + $0x3a8] sm:$0xff] }
 0x570   :  { %1729 = vmatpush.msrb.mxu3 %v1662_v63 }
 0x574   :  { %v1353_v48 = vpop.f32.mrf.mxu0 }
 0x575   :  { %2157 = vmatmul.msk.f32.gmra.mxu1 %vm25_vm0, %v3210_v31  ;;  %v1354_v56 = vadd.f32 %v3187_v28, %v1353_v48 }
 0x577   :  { %v3222_v57 = vadd.f32 %v1354_v56, %v2992_v2 }
 0x57c   :  { %v1356_v51 = vpop.f32.mrf.mxu0 }
 0x57d   :  { %2158 = vmatmul.msk.f32.gmra.mxu1 %vm25_vm0, %v3216_v1  ;;  %v1357_v59 = vadd.f32 %v3187_v28, %v1356_v51 }
 0x57f   :  { %v3231_v5 = vadd.f32 %v1357_v59, %v2998_v7 }
 0x584   :  { %v1359_v62 = vpop.f32.mrf.mxu0 }
 0x585   :  { %2159 = vmatmul.msk.f32.gmra.mxu1 %vm25_vm0, %v3222_v57  ;;  %v1360_v2 = vadd.f32 %v3187_v28, %v1359_v62 }
 0x587   :  { %v3240_v0 = vadd.f32 %v1360_v2, %v3004_v14 }
 0x58c   :  { %v1362_v13 = vpop.f32.mrf.mxu0 }
 0x58d   :  { %2160 = vmatmul.msk.f32.gmra.mxu1 %vm25_vm0, %v3231_v5  ;;  %v1363_v7 = vadd.f32 %v3187_v28, %v1362_v13 }
 0x58f   :  { %v3246_v35 = vadd.f32 %v1363_v7, %v3010_v17  ;;  %v1661_v17 = vld [vmem:[%s3466_s2 + $0x3a0] sm:$0xff] }
 0x590   :  { %1730 = vmatpush.msrb.mxu3 %v1661_v17 }
 0x594   :  { %v1365_v16 = vpop.f32.mrf.mxu0 }
 0x595   :  { %2161 = vmatmul.msk.f32.gmra.mxu1 %vm25_vm0, %v3240_v0  ;;  %v1366_v18 = vadd.f32 %v3187_v28, %v1365_v16 }
 0x597   :  { %v3252_v4 = vadd.f32 %v1366_v18, %v3019_v19 }
 0x59c   :  { %v1368_v3 = vpop.f32.mrf.mxu0 }
 0x59d   :  { %2162 = vmatmul.msk.f32.gmra.mxu1 %vm25_vm0, %v3246_v35  ;;  %v1369_v8 = vadd.f32 %v3187_v28, %v1368_v3 }
 0x59f   :  { %v3261_v21 = vadd.f32 %v1369_v8, %v3025_v40 }
 0x5a4   :  { %v1371_v14 = vpop.f32.mrf.mxu0 }
 0x5a5   :  { %2163 = vmatmul.msk.f32.gmra.mxu1 %vm25_vm0, %v3252_v4  ;;  %v1372_v19 = vadd.f32 %v3187_v28, %v1371_v14 }
 0x5a7   :  { %v3270_v26 = vadd.f32 %v1372_v19, %v3031_v24 }
 0x5ac   :  { %v1374_v10 = vpop.f32.mrf.mxu0 }
 0x5ad   :  { %2164 = vmatmul.msk.f32.gmra.mxu1 %vm25_vm0, %v3261_v21  ;;  %v1375_v40 = vadd.f32 %v3187_v28, %v1374_v10 }
 0x5af   :  { %v3276_v30 = vadd.f32 %v1375_v40, %v3037_v41 }
 0x5b4   :  { %v1377_v15 = vpop.f32.mrf.mxu0 }
 0x5b5   :  { %2165 = vmatmul.msk.f32.gmra.mxu1 %vm25_vm0, %v3270_v26  ;;  %v1378_v29 = vadd.f32 %v3187_v28, %v1377_v15 }
 0x5b7   :  { %v3282_v36 = vadd.f32 %v1378_v29, %v3058_v34  ;;  %v1858_v34 = vld [vmem:[%s3466_s2 + $0x408] sm:$0xff]  ;;  %v1855_v29 = vld [vmem:[%s3466_s2 + $0x3f0] sm:$0xff] }
 0x5b8   :  { %1921 = vmatpush.msrb.mxu0 %v1858_v34 }
 0x5ba   :  { %1922 = vmatpush.msrb.mxu0 %v1857_v42 }
 0x5bc   :  { %v1380_v6 = vpop.f32.mrf.mxu0  ;;  %1923 = vmatpush.msrb.mxu0 %v1856_v20 }
 0x5bd   :  { %2166 = vmatmul.msk.f32.gmra.mxu1 %vm25_vm0, %v3276_v30  ;;  %v1381_v24 = vadd.f32 %v3187_v28, %v1380_v6 }
 0x5be   :  { %1924 = vmatpush.msrb.mxu0 %v1855_v29 }
 0x5bf   :  { %v3288_v44 = vadd.f32 %v1381_v24, %v3070_v61 }
 0x5c4   :  { %v1383_v38 = vpop.f32.mrf.mxu0 }
 0x5c5   :  { %2167 = vmatmul.msk.f32.gmra.mxu1 %vm25_vm0, %v3282_v36  ;;  %v1384_v41 = vadd.f32 %v3187_v28, %v1383_v38 }
 0x5c7   :  { %v3300_v23 = vadd.f32 %v1384_v41, %v3082_v49  ;;  %v3317_v49 = vld [vmem:[%s3466_s2 + $0x398] ss:$0 sm:$0xff] }
 0x5cc   :  { %v1386_v25 = vpop.f32.mrf.mxu0 }
 0x5cd   :  { %2168 = vmatmul.msk.f32.gmra.mxu1 %vm25_vm0, %v3288_v44  ;;  %v1387_v9 = vadd.f32 %v3187_v28, %v1386_v25 }
 0x5cf   :  { %v3308_v32 = vadd.f32 %v1387_v9, %v3093_v60 }
 0x5d2   :  { %v1518_v39 = vpop.f32.mrf.mxu1 }
 0x5d3   :  { %v1519_v61 = vadd.f32 %v2242_v22, %v1518_v39 }
 0x5d5   :  { %v1524_v52 = vadd.f32 %v1519_v61, %v3087_v50  ;;  %2169 = vmatmul.msk.f32.gmra.mxu1 %vm25_vm0, %v3300_v23 }
 0x5d7   :  { %2187 = vmatmul.msk.f32.vlgmr.msra.gmra.mxu2 %vm25_vm0, %v1524_v52 }
 0x5da   :  { %v1521_v55 = vpop.f32.mrf.mxu1 }
 0x5db   :  { %v1522_v58 = vadd.f32 %v2242_v22, %v1521_v55 }
 0x5dd   :  { %v1525_v43 = vadd.f32 %v1522_v58, %v3098_v12  ;;  %2170 = vmatmul.msk.f32.gmra.mxu1 %vm25_vm0, %v3308_v32 }
 0x5df   :  { %2188 = vmatmul.msk.f32.gmra.mxu2 %vm25_vm0, %v1525_v43 }
 0x5e2   :  { %v1597_v50 = vpop.f32.mrf.mxu1 }
 0x5e3   :  { %v1598_v28 = vadd.f32 %v3317_v49, %v1597_v50 }
 0x5e5   :  { %v1645_v45 = vmax.f32 %v1598_v28, 0.0  ;;  %v2244_v28 = vld [vmem:[%s3466_s2 + $0x3e8] ss:$0 sm:$0xff] }
 0x5e7   :  { %2171 = vmatmul.msk.f32.vlgmr.msrb.gmra.mxu3 %vm25_vm0, %v1645_v45 }
 0x5ea   :  { %v1600_v60 = vpop.f32.mrf.mxu1 }
 0x5eb   :  { %v1601_v37 = vadd.f32 %v3317_v49, %v1600_v60 }
 0x5ed   :  { %v1646_v12 = vmax.f32 %v1601_v37, 0.0 }
 0x5ef   :  { %2172 = vmatmul.msk.f32.gmra.mxu3 %vm25_vm0, %v1646_v12 }
 0x5f2   :  { %v1603_v47 = vpop.f32.mrf.mxu1 }
 0x5f3   :  { %v1604_v53 = vadd.f32 %v3317_v49, %v1603_v47 }
 0x5f5   :  { %v1647_v46 = vmax.f32 %v1604_v53, 0.0 }
 0x5f7   :  { %2173 = vmatmul.msk.f32.gmra.mxu3 %vm25_vm0, %v1647_v46  ;;  %v3374_v46 = vld [vmem:[%s3466_s2 + $0x3c0] ss:$0 sm:$0xff] }
 0x5fa   :  { %v1606_v48 = vpop.f32.mrf.mxu1 }
 0x5fb   :  { %v1607_v54 = vadd.f32 %v3317_v49, %v1606_v48 }
 0x5fd   :  { %v1648_v51 = vmax.f32 %v1607_v54, 0.0 }
 0x5ff   :  { %2174 = vmatmul.msk.f32.gmra.mxu3 %vm25_vm0, %v1648_v51 }
 0x602   :  { %v1609_v56 = vpop.f32.mrf.mxu1 }
 0x603   :  { %v1610_v62 = vadd.f32 %v3317_v49, %v1609_v56 }
 0x605   :  { %v1649_v59 = vmax.f32 %v1610_v62, 0.0 }
 0x607   :  { %2175 = vmatmul.msk.f32.gmra.mxu3 %vm25_vm0, %v1649_v59 }
 0x60a   :  { %v1612_v63 = vpop.f32.mrf.mxu1 }
 0x60b   :  { %v1613_v13 = vadd.f32 %v3317_v49, %v1612_v63 }
 0x60d   :  { %v1650_v2 = vmax.f32 %v1613_v13, 0.0 }
 0x60f   :  { %2176 = vmatmul.msk.f32.gmra.mxu3 %vm25_vm0, %v1650_v2 }
 0x612   :  { %v1615_v16 = vpop.f32.mrf.mxu1 }
 0x613   :  { %v1616_v7 = vadd.f32 %v3317_v49, %v1615_v16 }
 0x615   :  { %v1651_v3 = vmax.f32 %v1616_v7, 0.0 }
 0x617   :  { %2177 = vmatmul.msk.f32.gmra.mxu3 %vm25_vm0, %v1651_v3 }
 0x61a   :  { %v1618_v18 = vpop.f32.mrf.mxu1 }
 0x61b   :  { %v1619_v14 = vadd.f32 %v3317_v49, %v1618_v18 }
 0x61d   :  { %v1652_v8 = vmax.f32 %v1619_v14, 0.0 }
 0x61f   :  { %2178 = vmatmul.msk.f32.gmra.mxu3 %vm25_vm0, %v1652_v8 }
 0x622   :  { %v1621_v17 = vpop.f32.mrf.mxu1 }
 0x623   :  { %v1622_v10 = vadd.f32 %v3317_v49, %v1621_v17 }
 0x625   :  { %v1653_v19 = vmax.f32 %v1622_v10, 0.0 }
 0x627   :  { %2179 = vmatmul.msk.f32.gmra.mxu3 %vm25_vm0, %v1653_v19 }
 0x62a   :  { %v1624_v11 = vpop.f32.mrf.mxu1 }
 0x62b   :  { %v1625_v15 = vadd.f32 %v3317_v49, %v1624_v11 }
 0x62d   :  { %v1654_v40 = vmax.f32 %v1625_v15, 0.0 }
 0x62f   :  { %2180 = vmatmul.msk.f32.gmra.mxu3 %vm25_vm0, %v1654_v40 }
 0x632   :  { %v1627_v6 = vpop.f32.mrf.mxu1 }
 0x633   :  { %v1628_v24 = vadd.f32 %v3317_v49, %v1627_v6 }
 0x635   :  { %v1655_v38 = vmax.f32 %v1628_v24, 0.0 }
 0x637   :  { %2181 = vmatmul.msk.f32.gmra.mxu3 %vm25_vm0, %v1655_v38 }
 0x63a   :  { %v1630_v41 = vpop.f32.mrf.mxu1 }
 0x63b   :  { %v1631_v22 = vadd.f32 %v3317_v49, %v1630_v41  ;;  %v1443_v41 = vpop.permute.xlu2 %1442 }
 0x63d   :  { %v1656_v34 = vmax.f32 %v1631_v22, 0.0 }
 0x63f   :  { %2182 = vmatmul.msk.f32.gmra.mxu3 %vm25_vm0, %v1656_v34 }
 0x642   :  { %v1633_v39 = vpop.f32.mrf.mxu1 }
 0x643   :  { %v1634_v61 = vadd.f32 %v3317_v49, %v1633_v39  ;;  %v2255_v39 = vld [vmem:[%s3464_s0] sm:$0xff] }
 0x645   :  { %v1657_v25 = vmax.f32 %v1634_v61, 0.0 }
 0x647   :  { %2183 = vmatmul.msk.f32.gmra.mxu3 %vm25_vm0, %v1657_v25 }
 0x64a   :  { %v1636_v52 = vpop.f32.mrf.mxu1 }
 0x64b   :  { %v1637_v9 = vadd.f32 %v3317_v49, %v1636_v52 }
 0x64d   :  { %v1658_v55 = vmax.f32 %v1637_v9, 0.0 }
 0x64f   :  { %2184 = vmatmul.msk.f32.gmra.mxu3 %vm25_vm0, %v1658_v55 }
 0x652   :  { %v1639_v58 = vpop.f32.mrf.mxu1 }
 0x653   :  { %v1640_v43 = vadd.f32 %v3317_v49, %v1639_v58 }
 0x655   :  { %v1659_v50 = vmax.f32 %v1640_v43, 0.0 }
 0x657   :  { %2185 = vmatmul.msk.f32.gmra.mxu3 %vm25_vm0, %v1659_v50 }
 0x65a   :  { %v1642_v45 = vpop.f32.mrf.mxu1  ;;  %v1825_v60 = vpop.f32.mrf.mxu2 }
 0x65b   :  { %v1643_v37 = vadd.f32 %v3317_v49, %v1642_v45  ;;  %v3362_v12 = vadd.f32 %v2244_v28, %v1825_v60 }
 0x65d   :  { %v1660_v42 = vmax.f32 %v1643_v37, 0.0  ;;  %1833 = vrot.lane.b32.xlu0 %v3362_v12, %s2284_s15 }
 0x65f   :  { %2186 = vmatmul.msk.f32.gmra.mxu3 %vm25_vm0, %v1660_v42 }
 0x662   :  { %v1828_v47 = vpop.f32.mrf.mxu2 }
 0x663   :  { %v3367_v53 = vadd.f32 %v2244_v28, %v1828_v47  ;;  %v2246_v47 = vld [vmem:[%s3466_s2 + $0x410] ss:$0 sm:$0xff] }
 0x665   :  { %1835 = vrot.lane.b32.xlu1 %v3367_v53, %s2284_s15 }
 0x66a   :  { %v1732_v49 = vpop.f32.mrf.mxu3 }
 0x66b   :  { %v1733_v48 = vadd.f32 %v3374_v46, %v1732_v49 }
 0x66d   :  { %v1780_v54 = vadd.f32 %v1733_v48, %v3192_v33 }
 0x66f   :  { %2189 = vmatmul.msk.f32.vlgmr.msrb.gmra.mxu0 %vm25_vm0, %v1780_v54 }
 0x672   :  { %v1735_v51 = vpop.f32.mrf.mxu3 }
 0x673   :  { %v1736_v56 = vadd.f32 %v3374_v46, %v1735_v51 }
 0x675   :  { %v1781_v62 = vadd.f32 %v1736_v56, %v3201_v27 }
 0x677   :  { %2190 = vmatmul.msk.f32.gmra.mxu0 %vm25_vm0, %v1781_v62 }
 0x67a   :  { %v1738_v59 = vpop.f32.mrf.mxu3 }
 0x67b   :  { %v1739_v63 = vadd.f32 %v3374_v46, %v1738_v59 }
 0x67d   :  { %v1782_v13 = vadd.f32 %v1739_v63, %v3210_v31 }
 0x67f   :  { %2191 = vmatmul.msk.f32.gmra.mxu0 %vm25_vm0, %v1782_v13 }
 0x682   :  { %v1741_v2 = vpop.f32.mrf.mxu3 }
 0x683   :  { %v1742_v20 = vadd.f32 %v3374_v46, %v1741_v2 }
 0x685   :  { %v1783_v33 = vadd.f32 %v1742_v20, %v3216_v1 }
 0x687   :  { %2192 = vmatmul.msk.f32.gmra.mxu0 %vm25_vm0, %v1783_v33 }
 0x68a   :  { %v1744_v16 = vpop.f32.mrf.mxu3 }
 0x68b   :  { %v1745_v7 = vadd.f32 %v3374_v46, %v1744_v16 }
 0x68d   :  { %v1784_v27 = vadd.f32 %v1745_v7, %v3222_v57 }
 0x68f   :  { %2193 = vmatmul.msk.f32.gmra.mxu0 %vm25_vm0, %v1784_v27 }
 0x692   :  { %v1747_v3 = vpop.f32.mrf.mxu3 }
 0x693   :  { %v1748_v18 = vadd.f32 %v3374_v46, %v1747_v3 }
 0x695   :  { %v1785_v31 = vadd.f32 %v1748_v18, %v3231_v5 }
 0x697   :  { %2194 = vmatmul.msk.f32.gmra.mxu0 %vm25_vm0, %v1785_v31 }
 0x69a   :  { %v1750_v14 = vpop.f32.mrf.mxu3 }
 0x69b   :  { %v1751_v8 = vadd.f32 %v3374_v46, %v1750_v14 }
 0x69d   :  { %v1786_v1 = vadd.f32 %v1751_v8, %v3240_v0 }
 0x69f   :  { %2195 = vmatmul.msk.f32.gmra.mxu0 %vm25_vm0, %v1786_v1 }
 0x6a2   :  { %v1753_v17 = vpop.f32.mrf.mxu3 }
 0x6a3   :  { %v1754_v10 = vadd.f32 %v3374_v46, %v1753_v17 }
 0x6a5   :  { %v1787_v57 = vadd.f32 %v1754_v10, %v3246_v35 }
 0x6a7   :  { %2196 = vmatmul.msk.f32.gmra.mxu0 %vm25_vm0, %v1787_v57 }
 0x6aa   :  { %v1756_v19 = vpop.f32.mrf.mxu3 }
 0x6ab   :  { %v1757_v11 = vadd.f32 %v3374_v46, %v1756_v19 }
 0x6ad   :  { %v1788_v5 = vadd.f32 %v1757_v11, %v3252_v4 }
 0x6af   :  { %2197 = vmatmul.msk.f32.gmra.mxu0 %vm25_vm0, %v1788_v5 }
 0x6b2   :  { %v1759_v15 = vpop.f32.mrf.mxu3 }
 0x6b3   :  { %v1760_v40 = vadd.f32 %v3374_v46, %v1759_v15 }
 0x6b5   :  { %v1789_v0 = vadd.f32 %v1760_v40, %v3261_v21 }
 0x6b7   :  { %2198 = vmatmul.msk.f32.gmra.mxu0 %vm25_vm0, %v1789_v0 }
 0x6ba   :  { %v1762_v29 = vpop.f32.mrf.mxu3 }
 0x6bb   :  { %v1763_v6 = vadd.f32 %v3374_v46, %v1762_v29 }
 0x6bd   :  { %v1790_v35 = vadd.f32 %v1763_v6, %v3270_v26  ;;  %v1448_v26 = vadd.f32 %v2255_v39, %v1443_v41 }
 0x6bf   :  { %2199 = vmatmul.msk.f32.gmra.mxu0 %vm25_vm0, %v1790_v35 }
 0x6c2   :  { %v1765_v24 = vpop.f32.mrf.mxu3 }
 0x6c3   :  { %v1766_v38 = vadd.f32 %v3374_v46, %v1765_v24 }
 0x6c5   :  { %v1791_v4 = vadd.f32 %v1766_v38, %v3276_v30  ;;  %v1445_v30 = vpop.permute.xlu2 %1444 }
 0x6c7   :  { %2200 = vmatmul.msk.f32.gmra.mxu0 %vm25_vm0, %v1791_v4 }
 0x6ca   :  { %v1768_v22 = vpop.f32.mrf.mxu3 }
 0x6cb   :  { %v1769_v21 = vadd.f32 %v3374_v46, %v1768_v22 }
 0x6cd   :  { %v1792_v34 = vadd.f32 %v1769_v21, %v3282_v36  ;;  %v2256_v36 = vld [vmem:[%s3464_s0 + $0x8] sm:$0xff] }
 0x6ce   :  { %v1449_v58 = vadd.f32 %v2256_v36, %v1445_v30 }
 0x6cf   :  { %2201 = vmatmul.msk.f32.gmra.mxu0 %vm25_vm0, %v1792_v34  ;;  %v1834_v61 = vpop.permute.xlu0 %1833 }
 0x6d0   :  { %v1839_v25 = vadd.f32 %v1834_v61, %v1448_v26 }
 0x6d2   :  { %v1771_v52 = vpop.f32.mrf.mxu3  ;;  %1843 = vrot.lane.b32.xlu2 %v1839_v25, %s2285_s28 }
 0x6d3   :  { %v1772_v9 = vadd.f32 %v3374_v46, %v1771_v52 }
 0x6d5   :  { %v1793_v55 = vadd.f32 %v1772_v9, %v3288_v44 }
 0x6d7   :  { %2202 = vmatmul.msk.f32.gmra.mxu0 %vm25_vm0, %v1793_v55  ;;  %v1836_v43 = vpop.permute.xlu1 %1835 }
 0x6d8   :  { %v1840_v50 = vadd.f32 %v1836_v43, %v1449_v58 }
 0x6da   :  { %v1774_v28 = vpop.f32.mrf.mxu3  ;;  %1845 = vrot.lane.b32.xlu0 %v1840_v50, %s2285_s28 }
 0x6db   :  { %v1775_v45 = vadd.f32 %v3374_v46, %v1774_v28 }
 0x6dd   :  { %v1794_v60 = vadd.f32 %v1775_v45, %v3300_v23 }
 0x6df   :  { %2203 = vmatmul.msk.f32.gmra.mxu0 %vm25_vm0, %v1794_v60 }
 0x6e2   :  { %v1777_v37 = vpop.f32.mrf.mxu3 }
 0x6e3   :  { %v1778_v44 = vadd.f32 %v3374_v46, %v1777_v37 }
 0x6e5   :  { %v1795_v42 = vadd.f32 %v1778_v44, %v3308_v32 }
 0x6e7   :  { %2204 = vmatmul.msk.f32.gmra.mxu0 %vm25_vm0, %v1795_v42  ;;  %vm1852_vm0 = vcmask 105472  }
 0x6ec   :  { %v1926_v49 = vpop.f32.mrf.mxu0 }
 0x6ed   :  { %v1927_v48 = vadd.f32 %v2246_v47, %v1926_v49 }
 0x6ef   :  { %1975 = vst.msk [vmem:[#allocation2] sm:$0xff] %vm1974_vm14, %v1927_v48 }
 0x6f4   :  { %v1929_v54 = vpop.f32.mrf.mxu0 }
 0x6f5   :  { %v1930_v23 = vadd.f32 %v2246_v47, %v1929_v54 }
 0x6f7   :  { %1976 = vst.msk [vmem:[#allocation2 + $0x8] sm:$0xff] %vm1974_vm14, %v1930_v23 }
 0x6fc   :  { %v1932_v51 = vpop.f32.mrf.mxu0 }
 0x6fd   :  { %v1933_v56 = vadd.f32 %v2246_v47, %v1932_v51 }
 0x6ff   :  { %1977 = vst.msk [vmem:[#allocation2 + $0x10] sm:$0xff] %vm1974_vm14, %v1933_v56 }
 0x704   :  { %v1935_v32 = vpop.f32.mrf.mxu0 }
 0x705   :  { %v1936_v46 = vadd.f32 %v2246_v47, %v1935_v32 }
 0x707   :  { %1978 = vst.msk [vmem:[#allocation2 + $0x18] sm:$0xff] %vm1974_vm14, %v1936_v46 }
 0x70c   :  { %v1938_v62 = vpop.f32.mrf.mxu0 }
 0x70d   :  { %v1939_v59 = vadd.f32 %v2246_v47, %v1938_v62 }
 0x70f   :  { %1979 = vst.msk [vmem:[#allocation2 + $0x20] sm:$0xff] %vm1974_vm14, %v1939_v59 }
 0x714   :  { %v1941_v63 = vpop.f32.mrf.mxu0 }
 0x715   :  { %v1942_v13 = vadd.f32 %v2246_v47, %v1941_v63 }
 0x717   :  { %1980 = vst.msk [vmem:[#allocation2 + $0x28] sm:$0xff] %vm1974_vm14, %v1942_v13 }
 0x71c   :  { %v1944_v2 = vpop.f32.mrf.mxu0 }
 0x71d   :  { %v1945_v20 = vadd.f32 %v2246_v47, %v1944_v2 }
 0x71f   :  { %1981 = vst.msk [vmem:[#allocation2 + $0x30] sm:$0xff] %vm1974_vm14, %v1945_v20 }
 0x724   :  { %v1947_v33 = vpop.f32.mrf.mxu0 }
 0x725   :  { %v1948_v16 = vadd.f32 %v2246_v47, %v1947_v33 }
 0x727   :  { %1982 = vst.msk [vmem:[#allocation2 + $0x38] sm:$0xff] %vm1974_vm14, %v1948_v16 }
 0x72c   :  { %v1950_v7 = vpop.f32.mrf.mxu0  ;;  %v1844_v27 = vpop.permute.xlu2 %1843 }
 0x72d   :  { %v1951_v3 = vadd.f32 %v2246_v47, %v1950_v7  ;;  %v1850_v18 = vsel %vm1849_vm15, %v1844_v27, %v3362_v12 }
 0x72e   :  { %1853 = vst.msk [vmem:[%s3467_s3] sm:$0xff] %vm1852_vm0, %v1850_v18 }
 0x72f   :  { %1983 = vst.msk [vmem:[#allocation2 + $0x40] sm:$0xff] %vm1974_vm14, %v1951_v3 }
 0x734   :  { %v1953_v31 = vpop.f32.mrf.mxu0 }
 0x735   :  { %v1954_v14 = vadd.f32 %v2246_v47, %v1953_v31 }
 0x737   :  { %1984 = vst.msk [vmem:[#allocation2 + $0x48] sm:$0xff] %vm1974_vm14, %v1954_v14 }
 0x73c   :  { %v1956_v8 = vpop.f32.mrf.mxu0 }
 0x73d   :  { %v1957_v1 = vadd.f32 %v2246_v47, %v1956_v8 }
 0x73f   :  { %1985 = vst.msk [vmem:[#allocation2 + $0x50] sm:$0xff] %vm1974_vm14, %v1957_v1 }
 0x744   :  { %v1959_v17 = vpop.f32.mrf.mxu0 }
 0x745   :  { %v1960_v10 = vadd.f32 %v2246_v47, %v1959_v17 }
 0x747   :  { %1986 = vst.msk [vmem:[#allocation2 + $0x58] sm:$0xff] %vm1974_vm14, %v1960_v10 }
 0x74c   :  { %v1962_v12 = vpop.f32.mrf.mxu0  ;;  %v1846_v57 = vpop.permute.xlu0 %1845 }
 0x74d   :  { %v1963_v19 = vadd.f32 %v2246_v47, %v1962_v12  ;;  %v1851_v11 = vsel %vm1849_vm15, %v1846_v57, %v3367_v53 }
 0x74e   :  { %1854 = vst.msk [vmem:[%s3467_s3 + $0x8] sm:$0xff] %vm1852_vm0, %v1851_v11  ;;  %s2287_s3 = smov 128  }
 0x74f   :  { %1987 = vst.msk [vmem:[#allocation2 + $0x60] sm:$0xff] %vm1974_vm14, %v1963_v19 }
 0x754   :  { %v1965_v5 = vpop.f32.mrf.mxu0 }
 0x755   :  { %v1966_v15 = vadd.f32 %v2246_v47, %v1965_v5 }
 0x757   :  { %1988 = vst.msk [vmem:[#allocation2 + $0x68] sm:$0xff] %vm1974_vm14, %v1966_v15 }
 0x75c   :  { %v1968_v40 = vpop.f32.mrf.mxu0 }
 0x75d   :  { %v1969_v0 = vadd.f32 %v2246_v47, %v1968_v40 }
 0x75f   :  { %1989 = vst.msk [vmem:[#allocation2 + $0x70] sm:$0xff] %vm1974_vm14, %v1969_v0 }
 0x764   :  { %v1971_v53 = vpop.f32.mrf.mxu0 }
 0x765   :  { %v1972_v29 = vadd.f32 %v2246_v47, %v1971_v53 }
 0x767   :  { %1990 = vst.msk [vmem:[#allocation2 + $0x78] sm:$0xff] %vm1974_vm14, %v1972_v29 }
 0x768   :  { %2005 = dma.vmem_to_hbm [thread:$0]  %s1998_s9, 2048, %s2000_s11, [#allocation3], %s2287_s3, %s2287_s3, %s2288_s12  }
 0x769   :  { %2281 = dma.done.wait [#allocation3], 2048  }
 0x76a   :  { %2282 = vsyncadd [#allocation3], 4294965248 }
 0x76b   :  { %2012 = vsyncpa [#allocation3], 1 }

</bundles_post_ra>
